<compile_context>
chip_gen: v7x
topology: tpu7x:2x2x1
jax: 0.10.0
libtpu: 0.0.40
codegen_flags: <defaults>
</compile_context>

<pallas_src>
from functools import partial

import jax
import jax.numpy as jnp
from jax.experimental import pallas as pl
from jax.experimental.pallas import tpu as pltpu

LANE = 128


def _round_up(x, m):
    return ((x + m - 1) // m) * m


def _tensorcores_per_device():
    """2 TensorCores per device on megacore chips (v4/v5p/v7x), else 1."""
    try:
        kind = jax.devices()[0].device_kind.lower()
    except Exception:
        return 1
    if "v7" in kind or "v4" in kind or "v5p" in kind:
        return 2
    return 1


# ----------------------------------------------------------------------------
# Kernel: full VAE forward for one batch tile. Weights are full (grid-invariant)
# VMEM blocks; only the batch dimension is tiled over the grid.
# ----------------------------------------------------------------------------
def vae_forward_kernel(
    x_ref,                 # (bm, D_pad)  bf16
    eps_ref,               # (bm, Z_pad)  f32 (zero in padded lanes)
    w1_ref, b1_ref,        # (D_pad, H_pad) bf16, (1, H_pad) f32       img_2hid
    wms_ref, bms_ref,      # (H_pad, 2*Z_pad) bf16, (1, 2*Z_pad) f32   hid_2mu || hid_2sigma
    w3_ref, b3_ref,        # (Z_pad, H_pad) bf16, (1, H_pad) f32       z_2hid
    w4_ref, b4_ref,        # (H_pad, D_pad) bf16, (1, D_pad) f32       hid_2img
    xr_ref,                # out: (bm, D_pad)      bf16
    ms_ref,                # out: (bm, 2*Z_pad)    f32  (mu || sigma, padded)
):
    zp = eps_ref.shape[-1]

    # ---- encode ---- (x already bf16; f32 accumulation via preferred_element_type)
    h = jnp.dot(x_ref[...], w1_ref[...],
                preferred_element_type=jnp.float32) + b1_ref[...]
    h = jnp.maximum(h, 0.0)

    # fused mu/sigma projection: one matmul, lane-dense result
    musig = jnp.dot(h.astype(jnp.bfloat16), wms_ref[...],
                    preferred_element_type=jnp.float32) + bms_ref[...]
    ms_ref[...] = musig                            # lane-dense (bm, 2*Z_pad) store

    mu = musig[:, :zp]                             # 128-lane aligned slices
    sigma = musig[:, zp:]

    # ---- reparameterize: z = mu + eps * sigma (padded lanes stay zero) ----
    z = mu + eps_ref[...] * sigma

    # ---- decode ----
    h2 = jnp.dot(z.astype(jnp.bfloat16), w3_ref[...],
                 preferred_element_type=jnp.float32) + b3_ref[...]
    h2 = jnp.maximum(h2, 0.0)
    logits = jnp.dot(h2.astype(jnp.bfloat16), w4_ref[...],
                     preferred_element_type=jnp.float32) + b4_ref[...]
    # sigmoid in f32 for accuracy (safe on all generations), store as bf16.
    xr_ref[...] = jax.nn.sigmoid(logits).astype(xr_ref.dtype)


# ----------------------------------------------------------------------------
# Parameter packing: pad to 128-lane multiples, fuse mu/sigma weights, bf16 cast
# ----------------------------------------------------------------------------
def prepare_params(params, input_dim, h_dim, z_dim):
    D_pad = _round_up(input_dim, LANE)
    H_pad = _round_up(h_dim, LANE)
    Z_pad = _round_up(z_dim, LANE)

    def pad2(a, rows, cols):
        return jnp.pad(a, ((0, rows - a.shape[0]), (0, cols - a.shape[1])))

    w1p = pad2(params["w1"], D_pad, H_pad).astype(jnp.bfloat16)
    b1p = pad2(params["b1"], 1, H_pad)
    wmsp = jnp.concatenate(
        [pad2(params["wmu"], H_pad, Z_pad), pad2(params["wsg"], H_pad, Z_pad)],
        axis=1).astype(jnp.bfloat16)
    bmsp = jnp.concatenate(
        [pad2(params["bmu"], 1, Z_pad), pad2(params["bsg"], 1, Z_pad)], axis=1)
    w3p = pad2(params["w3"], Z_pad, H_pad).astype(jnp.bfloat16)
    b3p = pad2(params["b3"], 1, H_pad)
    w4p = pad2(params["w4"], H_pad, D_pad).astype(jnp.bfloat16)
    b4p = pad2(params["b4"], 1, D_pad)

    return dict(w1=w1p, b1=b1p, wms=wmsp, bms=bmsp, w3=w3p, b3=b3p,
                w4=w4p, b4=b4p,
                dims=(input_dim, h_dim, z_dim, D_pad, H_pad, Z_pad))


# ----------------------------------------------------------------------------
# jit-fused padded forward: pad/cast + pallas_call + unpad in one XLA program
# (static shape info passed as static args so the jit cache works across calls)
# ----------------------------------------------------------------------------
@partial(jax.jit, static_argnames=("dims", "B", "bm", "B_pad"))
def _vae_forward_padded(x, eps, w1, b1, wms, bms, w3, b3, w4, b4,
                        *, dims, B, bm, B_pad):
    input_dim, h_dim, z_dim, D_pad, H_pad, Z_pad = dims
    D = input_dim

    # Pad AND cast here (fused with the kernel call; no standalone HBM trip).
    xp = jnp.zeros((B_pad, D_pad), jnp.bfloat16).at[:B, :D].set(
        x.astype(jnp.bfloat16))
    epsp = jnp.zeros((B_pad, Z_pad), jnp.float32).at[:B, :z_dim].set(eps)

    grid = (B_pad // bm,)

    def full_spec(shape):
        # Grid-invariant block: Pallas keeps it resident, no per-step re-DMA.
        return pl.BlockSpec(shape, lambda i: (0, 0))

    in_specs = [
        pl.BlockSpec((bm, D_pad), lambda i: (i, 0)),     # x (bf16)
        pl.BlockSpec((bm, Z_pad), lambda i: (i, 0)),     # eps (f32)
        full_spec(w1.shape), full_spec(b1.shape),
        full_spec(wms.shape), full_spec(bms.shape),
        full_spec(w3.shape), full_spec(b3.shape),
        full_spec(w4.shape), full_spec(b4.shape),
    ]
    out_specs = [
        pl.BlockSpec((bm, D_pad), lambda i: (i, 0)),       # x_reconst (bf16, padded)
        pl.BlockSpec((bm, 2 * Z_pad), lambda i: (i, 0)),   # mu || sigma (f32, padded)
    ]
    out_shape = [
        jax.ShapeDtypeStruct((B_pad, D_pad), jnp.bfloat16),
        jax.ShapeDtypeStruct((B_pad, 2 * Z_pad), jnp.float32),
    ]

    xr_pad, ms_pad = pl.pallas_call(
        vae_forward_kernel,
        out_shape=out_shape,
        grid=grid,
        in_specs=in_specs,
        out_specs=out_specs,
        compiler_params=pltpu.CompilerParams(
            dimension_semantics=("parallel",),
            # Above v5e's 16 MiB default scoped limit, equal to the v6e/v7x
            # defaults and comfortably under v7x's 64 MiB physical VMEM.
            vmem_limit_bytes=32 * 1024 * 1024,
        ),
    )(xp, epsp, w1, b1, wms, bms, w3, b3, w4, b4)

    x_reconst = xr_pad[:B, :D].astype(jnp.float32)
    mu = ms_pad[:B, :z_dim]
    sigma = ms_pad[:B, Z_pad:Z_pad + z_dim]
    return x_reconst, mu, sigma


# ----------------------------------------------------------------------------
# Wrapper: generation-aware batch tiling + dispatch to the jit-fused forward
# ----------------------------------------------------------------------------
def vae_forward(x, packed, eps, *, block_m=512):
    """x: (B, input_dim) f32; eps: (B, z_dim) f32 -> (x_reconst, mu, sigma)."""
    dims = packed["dims"]
    input_dim, h_dim, z_dim, D_pad, H_pad, Z_pad = dims
    B, D = x.shape
    assert D == input_dim
    assert eps.shape == (B, z_dim)

    ncores = _tensorcores_per_device()
    B8 = _round_up(B, 8)
    bm = _round_up(max(min(block_m, B8), 8), 8)
    if ncores > 1:
        # Dual-TC chip (v7x/megacore): even number of equal "parallel" grid
        # steps so both TensorCores get balanced work.
        steps = _round_up(pl.cdiv(B8, bm), ncores)
        bm = _round_up(pl.cdiv(B8, steps), 8)
        B_pad = steps * bm
    else:
        # Single-TC chip (v5e/v6e): the grid is a serial loop -> prefer fewer,
        # larger steps; no forced split.
        B_pad = _round_up(B8, bm)

    return _vae_forward_padded(
        x, eps,
        packed["w1"], packed["b1"], packed["wms"], packed["bms"],
        packed["w3"], packed["b3"], packed["w4"], packed["b4"],
        dims=dims, B=B, bm=bm, B_pad=B_pad)


# ----------------------------------------------------------------------------
# Deterministic parameter init (PyTorch nn.Linear-style uniform(-1/sqrt(in), +))
# Weights stored as [in, out] (transposed vs. PyTorch's [out, in]), f32.
# ----------------------------------------------------------------------------
def init_params(key, input_dim, h_dim=200, z_dim=20):
    def linear(key, fan_in, fan_out):
        kw, kb = jax.random.split(key)
        bound = 1.0 / jnp.sqrt(fan_in)
        w = jax.random.uniform(kw, (fan_in, fan_out), jnp.float32, -bound, bound)
        b = jax.random.uniform(kb, (1, fan_out), jnp.float32, -bound, bound)
        return w, b

    k1, k2, k3, k4, k5 = jax.random.split(key, 5)
    w1, b1 = linear(k1, input_dim, h_dim)     # img_2hid
    wmu, bmu = linear(k2, h_dim, z_dim)       # hid_2mu
    wsg, bsg = linear(k3, h_dim, z_dim)       # hid_2sigma
    w3, b3 = linear(k4, z_dim, h_dim)         # z_2hid
    w4, b4 = linear(k5, h_dim, input_dim)     # hid_2img
    return dict(w1=w1, b1=b1, wmu=wmu, bmu=bmu, wsg=wsg, bsg=bsg,
                w3=w3, b3=b3, w4=w4, b4=b4)


# Pure-JAX f32 reference for correctness check.
def vae_forward_ref(x, p, eps):
    h = jnp.maximum(x @ p["w1"] + p["b1"], 0.0)
    mu = h @ p["wmu"] + p["bmu"]
    sigma = h @ p["wsg"] + p["bsg"]
    z = mu + eps * sigma
    h2 = jnp.maximum(z @ p["w3"] + p["b3"], 0.0)
    xr = jax.nn.sigmoid(h2 @ p["w4"] + p["b4"])
    return xr, mu, sigma


if __name__ == "__main__":
    key = jax.random.PRNGKey(0)
    k_param, k_x, k_eps = jax.random.split(key, 3)

    B = 32             # small demo batch
    input_dim = 784    # MNIST-style flattened image
    h_dim = 200
    z_dim = 20

    params = init_params(k_param, input_dim, h_dim, z_dim)
    packed = prepare_params(params, input_dim, h_dim, z_dim)

    x = jax.random.normal(k_x, (B, input_dim), jnp.float32)
    # TODO(synk): eps is generated host-side (torch.randn_like equivalent);
    # in-kernel pltpu PRNG would change the random stream.
    eps = jax.random.normal(k_eps, (B, z_dim), jnp.float32)

    xr, mu, sigma = vae_forward(x, packed, eps)
    jax.block_until_ready((xr, mu, sigma))

    # Sanity check vs pure-f32 JAX reference. Kernel uses bf16 MXU operands /
    # bf16 x + x_reconst I/O with f32 accumulation, so tolerance is loosened.
    xr_r, mu_r, sg_r = vae_forward_ref(x, params, eps)
    assert jnp.allclose(xr, xr_r, atol=3e-2, rtol=3e-2), float(jnp.max(jnp.abs(xr - xr_r)))
    assert jnp.allclose(mu, mu_r, atol=3e-2, rtol=3e-2), float(jnp.max(jnp.abs(mu - mu_r)))
    assert jnp.allclose(sigma, sg_r, atol=3e-2, rtol=3e-2), float(jnp.max(jnp.abs(sigma - sg_r)))

    print("KERNEL_OK")
</pallas_src>

<mosaic_0001>
module attributes {stable_mosaic.version = 11 : i64} {
  func.func @vae_forward_kernel(%arg0: i32, %arg1: memref<32x896xbf16, #tpu.memory_space<vmem>>, %arg2: memref<32x128xf32, #tpu.memory_space<vmem>>, %arg3: memref<896x256xbf16, #tpu.memory_space<vmem>>, %arg4: memref<1x256xf32, #tpu.memory_space<vmem>>, %arg5: memref<256x256xbf16, #tpu.memory_space<vmem>>, %arg6: memref<1x256xf32, #tpu.memory_space<vmem>>, %arg7: memref<128x256xbf16, #tpu.memory_space<vmem>>, %arg8: memref<1x256xf32, #tpu.memory_space<vmem>>, %arg9: memref<256x896xbf16, #tpu.memory_space<vmem>>, %arg10: memref<1x896xf32, #tpu.memory_space<vmem>>, %arg11: memref<32x896xbf16, #tpu.memory_space<vmem>>, %arg12: memref<32x256xf32, #tpu.memory_space<vmem>>) attributes {dimension_semantics = [#tpu.dimension_semantics<parallel>], iteration_bounds = array<i64: 1>, scalar_prefetch = 0 : i64, scratch_operands = 0 : i64, tpu.core_type = #tpu.core_type<tc>, window_params = [{transform_indices = @transform_0, window_bounds = array<i64: 32, 896>}, {transform_indices = @transform_1, window_bounds = array<i64: 32, 128>}, {pipeline_mode = #tpu.pipeline_mode<synchronous>, transform_indices = @transform_2, window_bounds = array<i64: 896, 256>}, {pipeline_mode = #tpu.pipeline_mode<synchronous>, transform_indices = @transform_3, window_bounds = array<i64: 1, 256>}, {pipeline_mode = #tpu.pipeline_mode<synchronous>, transform_indices = @transform_4, window_bounds = array<i64: 256, 256>}, {pipeline_mode = #tpu.pipeline_mode<synchronous>, transform_indices = @transform_5, window_bounds = array<i64: 1, 256>}, {pipeline_mode = #tpu.pipeline_mode<synchronous>, transform_indices = @transform_6, window_bounds = array<i64: 128, 256>}, {pipeline_mode = #tpu.pipeline_mode<synchronous>, transform_indices = @transform_7, window_bounds = array<i64: 1, 256>}, {pipeline_mode = #tpu.pipeline_mode<synchronous>, transform_indices = @transform_8, window_bounds = array<i64: 256, 896>}, {pipeline_mode = #tpu.pipeline_mode<synchronous>, transform_indices = @transform_9, window_bounds = array<i64: 1, 896>}, {transform_indices = @transform_10, window_bounds = array<i64: 32, 896>}, {transform_indices = @transform_11, window_bounds = array<i64: 32, 256>}]} {
    %c0 = arith.constant 0 : index
    %c0_0 = arith.constant 0 : index
    %0 = vector.load %arg1[%c0, %c0_0] : memref<32x896xbf16, #tpu.memory_space<vmem>>, vector<32x896xbf16>
    %c0_1 = arith.constant 0 : index
    %c0_2 = arith.constant 0 : index
    %1 = vector.load %arg3[%c0_1, %c0_2] : memref<896x256xbf16, #tpu.memory_space<vmem>>, vector<896x256xbf16>
    %cst = arith.constant dense<0.000000e+00> : vector<32x256xf32>
    %2 = tpu.matmul %0, %1, %cst {dimension_numbers = #tpu.dot_dimension_numbers<[1], [0], [0], [1], [0, 0, 1, 1], [], []>} : vector<32x896xbf16>, vector<896x256xbf16>, vector<32x256xf32> -> vector<32x256xf32>
    %c0_3 = arith.constant 0 : index
    %c0_4 = arith.constant 0 : index
    %3 = vector.load %arg4[%c0_3, %c0_4] : memref<1x256xf32, #tpu.memory_space<vmem>>, vector<1x256xf32>
    %4 = vector.broadcast %3 : vector<1x256xf32> to vector<32x256xf32>
    %5 = arith.addf %2, %4 : vector<32x256xf32>
    %cst_5 = arith.constant 0.000000e+00 : f32
    %6 = vector.broadcast %cst_5 : f32 to vector<32x256xf32>
    %7 = arith.maximumf %5, %6 : vector<32x256xf32>
    %8 = arith.truncf %7 : vector<32x256xf32> to vector<32x256xbf16>
    %c0_6 = arith.constant 0 : index
    %c0_7 = arith.constant 0 : index
    %9 = vector.load %arg5[%c0_6, %c0_7] : memref<256x256xbf16, #tpu.memory_space<vmem>>, vector<256x256xbf16>
    %cst_8 = arith.constant dense<0.000000e+00> : vector<32x256xf32>
    %10 = tpu.matmul %8, %9, %cst_8 {dimension_numbers = #tpu.dot_dimension_numbers<[1], [0], [0], [1], [0, 0, 1, 1], [], []>} : vector<32x256xbf16>, vector<256x256xbf16>, vector<32x256xf32> -> vector<32x256xf32>
    %c0_9 = arith.constant 0 : index
    %c0_10 = arith.constant 0 : index
    %11 = vector.load %arg6[%c0_9, %c0_10] : memref<1x256xf32, #tpu.memory_space<vmem>>, vector<1x256xf32>
    %12 = vector.broadcast %11 : vector<1x256xf32> to vector<32x256xf32>
    %13 = arith.addf %10, %12 : vector<32x256xf32>
    %c0_11 = arith.constant 0 : index
    %c0_12 = arith.constant 0 : index
    %14 = vector.load %arg12[%c0_11, %c0_12] : memref<32x256xf32, #tpu.memory_space<vmem>>, vector<32x256xf32>
    tpu.vector_store %arg12[%c0_11, %c0_12], %13 {strides = array<i32>} : memref<32x256xf32, #tpu.memory_space<vmem>>, vector<32x256xf32>,
    %15 = vector.extract_strided_slice %13 {offsets = [0, 0], sizes = [32, 128], strides = [1, 1]} : vector<32x256xf32> to vector<32x128xf32>
    %16 = vector.extract_strided_slice %13 {offsets = [0, 128], sizes = [32, 128], strides = [1, 1]} : vector<32x256xf32> to vector<32x128xf32>
    %c0_13 = arith.constant 0 : index
    %c0_14 = arith.constant 0 : index
    %17 = vector.load %arg2[%c0_13, %c0_14] : memref<32x128xf32, #tpu.memory_space<vmem>>, vector<32x128xf32>
    %18 = arith.mulf %17, %16 : vector<32x128xf32>
    %19 = arith.addf %15, %18 : vector<32x128xf32>
    %20 = arith.truncf %19 : vector<32x128xf32> to vector<32x128xbf16>
    %c0_15 = arith.constant 0 : index
    %c0_16 = arith.constant 0 : index
    %21 = vector.load %arg7[%c0_15, %c0_16] : memref<128x256xbf16, #tpu.memory_space<vmem>>, vector<128x256xbf16>
    %cst_17 = arith.constant dense<0.000000e+00> : vector<32x256xf32>
    %22 = tpu.matmul %20, %21, %cst_17 {dimension_numbers = #tpu.dot_dimension_numbers<[1], [0], [0], [1], [0, 0, 1, 1], [], []>} : vector<32x128xbf16>, vector<128x256xbf16>, vector<32x256xf32> -> vector<32x256xf32>
    %c0_18 = arith.constant 0 : index
    %c0_19 = arith.constant 0 : index
    %23 = vector.load %arg8[%c0_18, %c0_19] : memref<1x256xf32, #tpu.memory_space<vmem>>, vector<1x256xf32>
    %24 = vector.broadcast %23 : vector<1x256xf32> to vector<32x256xf32>
    %25 = arith.addf %22, %24 : vector<32x256xf32>
    %cst_20 = arith.constant 0.000000e+00 : f32
    %26 = vector.broadcast %cst_20 : f32 to vector<32x256xf32>
    %27 = arith.maximumf %25, %26 : vector<32x256xf32>
    %28 = arith.truncf %27 : vector<32x256xf32> to vector<32x256xbf16>
    %c0_21 = arith.constant 0 : index
    %c0_22 = arith.constant 0 : index
    %29 = vector.load %arg9[%c0_21, %c0_22] : memref<256x896xbf16, #tpu.memory_space<vmem>>, vector<256x896xbf16>
    %cst_23 = arith.constant dense<0.000000e+00> : vector<32x896xf32>
    %30 = tpu.matmul %28, %29, %cst_23 {dimension_numbers = #tpu.dot_dimension_numbers<[1], [0], [0], [1], [0, 0, 1, 1], [], []>} : vector<32x256xbf16>, vector<256x896xbf16>, vector<32x896xf32> -> vector<32x896xf32>
    %c0_24 = arith.constant 0 : index
    %c0_25 = arith.constant 0 : index
    %31 = vector.load %arg10[%c0_24, %c0_25] : memref<1x896xf32, #tpu.memory_space<vmem>>, vector<1x896xf32>
    %32 = vector.broadcast %31 : vector<1x896xf32> to vector<32x896xf32>
    %33 = arith.addf %30, %32 : vector<32x896xf32>
    %34 = arith.negf %33 : vector<32x896xf32>
    %35 = math.exp %34 : vector<32x896xf32>
    %cst_26 = arith.constant 1.000000e+00 : f32
    %36 = vector.broadcast %cst_26 : f32 to vector<32x896xf32>
    %37 = arith.addf %36, %35 : vector<32x896xf32>
    %38 = arith.divf %36, %37 : vector<32x896xf32>
    %39 = arith.truncf %38 : vector<32x896xf32> to vector<32x896xbf16>
    %c0_27 = arith.constant 0 : index
    %c0_28 = arith.constant 0 : index
    %40 = vector.load %arg11[%c0_27, %c0_28] : memref<32x896xbf16, #tpu.memory_space<vmem>>, vector<32x896xbf16>
    tpu.vector_store %arg11[%c0_27, %c0_28], %39 {strides = array<i32>} : memref<32x896xbf16, #tpu.memory_space<vmem>>, vector<32x896xbf16>,
    return
  }
  func.func @transform_0(%arg0: i32) -> (i32, i32) {
    %c0_i32 = arith.constant 0 : i32
    %c0_i32_0 = arith.constant 0 : i32
    return %arg0, %c0_i32 : i32, i32
  }
  func.func @transform_1(%arg0: i32) -> (i32, i32) {
    %c0_i32 = arith.constant 0 : i32
    %c0_i32_0 = arith.constant 0 : i32
    return %arg0, %c0_i32 : i32, i32
  }
  func.func @transform_2(%arg0: i32) -> (i32, i32) {
    %c0_i32 = arith.constant 0 : i32
    %c0_i32_0 = arith.constant 0 : i32
    %c0_i32_1 = arith.constant 0 : i32
    return %c0_i32, %c0_i32_0 : i32, i32
  }
  func.func @transform_3(%arg0: i32) -> (i32, i32) {
    %c0_i32 = arith.constant 0 : i32
    %c0_i32_0 = arith.constant 0 : i32
    %c0_i32_1 = arith.constant 0 : i32
    return %c0_i32, %c0_i32_0 : i32, i32
  }
  func.func @transform_4(%arg0: i32) -> (i32, i32) {
    %c0_i32 = arith.constant 0 : i32
    %c0_i32_0 = arith.constant 0 : i32
    %c0_i32_1 = arith.constant 0 : i32
    return %c0_i32, %c0_i32_0 : i32, i32
  }
  func.func @transform_5(%arg0: i32) -> (i32, i32) {
    %c0_i32 = arith.constant 0 : i32
    %c0_i32_0 = arith.constant 0 : i32
    %c0_i32_1 = arith.constant 0 : i32
    return %c0_i32, %c0_i32_0 : i32, i32
  }
  func.func @transform_6(%arg0: i32) -> (i32, i32) {
    %c0_i32 = arith.constant 0 : i32
    %c0_i32_0 = arith.constant 0 : i32
    %c0_i32_1 = arith.constant 0 : i32
    return %c0_i32, %c0_i32_0 : i32, i32
  }
  func.func @transform_7(%arg0: i32) -> (i32, i32) {
    %c0_i32 = arith.constant 0 : i32
    %c0_i32_0 = arith.constant 0 : i32
    %c0_i32_1 = arith.constant 0 : i32
    return %c0_i32, %c0_i32_0 : i32, i32
  }
  func.func @transform_8(%arg0: i32) -> (i32, i32) {
    %c0_i32 = arith.constant 0 : i32
    %c0_i32_0 = arith.constant 0 : i32
    %c0_i32_1 = arith.constant 0 : i32
    return %c0_i32, %c0_i32_0 : i32, i32
  }
  func.func @transform_9(%arg0: i32) -> (i32, i32) {
    %c0_i32 = arith.constant 0 : i32
    %c0_i32_0 = arith.constant 0 : i32
    %c0_i32_1 = arith.constant 0 : i32
    return %c0_i32, %c0_i32_0 : i32, i32
  }
  func.func @transform_10(%arg0: i32) -> (i32, i32) {
    %c0_i32 = arith.constant 0 : i32
    %c0_i32_0 = arith.constant 0 : i32
    return %arg0, %c0_i32 : i32, i32
  }
  func.func @transform_11(%arg0: i32) -> (i32, i32) {
    %c0_i32 = arith.constant 0 : i32
    %c0_i32_0 = arith.constant 0 : i32
    return %arg0, %c0_i32 : i32, i32
  }
}

</mosaic_0001>

<bundles_post_ra>
// kernel: _vae_forward_padded.1
= control target key start
LH: loop header
LB: loop body
LE: loop exit
PB: predicated region body
PF: predicated region fallthrough
CT: control target
= control target key end

     0   :  { %17 = vsyncpa [#allocation3], 0  ;;  %s4187_s0 = inlined_call_operand.vmem [shape: bf16[32,896], index: 0, kind: input, shape index: {}]   ;;  %s4188_s1 = inlined_call_operand.vmem [shape: f32[32,128], index: 1, kind: input, shape index: {}]   ;;  %s4189_s2 = inlined_call_operand.hbm [shape: bf16[896,256], index: 2, kind: input, shape index: {}]   ;;  %s4190_s3 = inlined_call_operand.vmem [shape: f32[1,256], index: 3, kind: input, shape index: {}]   ;;  %s4191_s4 = inlined_call_operand.vmem [shape: bf16[256,256], index: 4, kind: input, shape index: {}]   ;;  %s4192_s5 = inlined_call_operand.vmem [shape: f32[1,256], index: 5, kind: input, shape index: {}]   ;;  %s4193_s6 = inlined_call_operand.vmem [shape: bf16[128,256], index: 6, kind: input, shape index: {}]   ;;  %s4194_s7 = inlined_call_operand.vmem [shape: f32[1,256], index: 7, kind: input, shape index: {}]   ;;  %s4195_s8 = inlined_call_operand.hbm [shape: bf16[256,896], index: 8, kind: input, shape index: {}]   ;;  %s4196_s9 = inlined_call_operand.vmem [shape: f32[1,896], index: 9, kind: input, shape index: {}]   ;;  %s4197_s10 = inlined_call_operand.vmem [shape: bf16[32,896], index: 10, kind: output, shape index: {0}]   ;;  %s4198_s11 = inlined_call_operand.vmem [shape: f32[32,256], index: 11, kind: output, shape index: {1}]  }
   0x1   :  { %18 = vsyncpa [#allocation5], 0  ;;  %s3738_s17 = smov [#allocation2]   ;;  %s3690_s21 = scalar_lea.hbm %s4189_s2, 14336 }
   0x2   :  { %s28_s18 = sshll.u32 %s3738_s17, 4  ;;  %p3691_p0 = scmp.ne.s32.totalorder %s4189_s2, %s3690_s21  ;;  %s29_s18 = int_to_ptr.vmem [resolvable:$true] %s28_s18 }
   0x3   :  { %p3694_p1 = scmp.lt.u32.totalorder %s3690_s21, %s4189_s2 }
   0x5   :  { %p3696_p2 = pnand %p3694_p1, %p3691_p0 }
   0x7   :  { %3699 = shalt.err (!%p3696_p2)
}
   0x8   :  { %s3700_s26 = scalar_lea.vmem %s29_s18, 14336  ;;  %p3705_p4 = scmp.lt.s32.totalorder %s29_s18, %s29_s18 }
   0x9   :  { %p3701_p3 = scmp.ne.s32.totalorder %s29_s18, %s3700_s26  ;;  %p3706_p5 = scmp.lt.s32.totalorder %s3700_s26, %s3700_s26 }
   0xb   :  { %p3707_p6 = por %p3706_p5, %p3705_p4 }
   0xd   :  { %p3708_p7 = pnand %p3707_p6, %p3701_p3 }
   0xf   :  { %3711 = shalt.err (!%p3708_p7)
}
  0x10   :  { %s3739_s27 = smov 128   ;;  %s3740_s28 = smov 8  }
  0x11   :  { %34 = dma.hbm_to_vmem [thread:$0]  %s4189_s2, 14336, %s29_s18, [#allocation3], %s3739_s27, %s3739_s27, %s3740_s28  }
  0x12   :  { %s3741_s12 = smov [#allocation4]   ;;  %s3712_s16 = scalar_lea.hbm %s4195_s8, 14336 }
  0x13   :  { %s50_s13 = sshll.u32 %s3741_s12, 4  ;;  %p3713_p8 = scmp.ne.s32.totalorder %s4195_s8, %s3712_s16  ;;  %s51_s13 = int_to_ptr.vmem [resolvable:$true] %s50_s13 }
  0x14   :  { %p3716_p9 = scmp.lt.u32.totalorder %s3712_s16, %s4195_s8 }
  0x16   :  { %p3718_p10 = pnand %p3716_p9, %p3713_p8 }
  0x18   :  { %3721 = shalt.err (!%p3718_p10)
}
  0x19   :  { %s3722_s22 = scalar_lea.vmem %s51_s13, 14336  ;;  %p3727_p12 = scmp.lt.s32.totalorder %s51_s13, %s51_s13 }
  0x1a   :  { %p3723_p11 = scmp.ne.s32.totalorder %s51_s13, %s3722_s22  ;;  %p3728_p13 = scmp.lt.s32.totalorder %s3722_s22, %s3722_s22 }
  0x1c   :  { %p3729_p0 = por %p3728_p13, %p3727_p12 }
  0x1e   :  { %p3730_p1 = pnand %p3729_p0, %p3723_p11 }
  0x20   :  { %3733 = shalt.err (!%p3730_p1)
}
  0x21   :  { %s3742_s2 = smov 448   ;;  %s3743_s18 = smov 28  }
  0x22   :  { %56 = dma.hbm_to_vmem [thread:$0]  %s4195_s8, 14336, %s51_s13, [#allocation5], %s3742_s2, %s3742_s2, %s3743_s18  }
  0x23   :  { %3734 = dma.done.wait [#allocation3], 14336  }
  0x24   :  { %3735 = vsyncadd [#allocation3], 4294952960 }
  0x25   :  { %3736 = dma.done.wait [#allocation5], 14336  }
  0x26   :  { %3737 = vsyncadd [#allocation5], 4294952960  ;;  %v3158_v0 = vld [vmem:[#allocation2 + $0x4] ss:$8 sps:$4 sm:$0xff]   ;;  %v3160_v1 = vld [vmem:[#allocation2] ss:$8 sps:$4 sm:$0xff]  }
  0x27   :  { %838 = vmatprep.subr.bf16.mxu0 %v3158_v0  ;;  %v3161_v2 = vld [vmem:[#allocation2 + $0x14] ss:$8 sps:$4 sm:$0xff]   ;;  %v3163_v3 = vld [vmem:[#allocation2 + $0x10] ss:$8 sps:$4 sm:$0xff]   ;;  %v3164_v4 = vld [vmem:[#allocation2 + $0x24] ss:$8 sps:$4 sm:$0xff]  }
  0x28   :  { %839 = vmatpush1.bf16.msra.mxu0 %v3160_v1  ;;  %v3166_v5 = vld [vmem:[#allocation2 + $0x20] ss:$8 sps:$4 sm:$0xff]   ;;  %v3167_v6 = vld [vmem:[#allocation2 + $0x34] ss:$8 sps:$4 sm:$0xff]   ;;  %v3169_v7 = vld [vmem:[#allocation2 + $0x30] ss:$8 sps:$4 sm:$0xff]  }
  0x29   :  { %840 = vmatprep.subr.bf16.mxu0 %v3161_v2  ;;  %v3170_v8 = vld [vmem:[#allocation2 + $0x44] ss:$8 sps:$4 sm:$0xff]   ;;  %v3172_v9 = vld [vmem:[#allocation2 + $0x40] ss:$8 sps:$4 sm:$0xff]   ;;  %v3173_v10 = vld [vmem:[#allocation2 + $0x54] ss:$8 sps:$4 sm:$0xff]  }
  0x2a   :  { %v3175_v11 = vld [vmem:[#allocation2 + $0x50] ss:$8 sps:$4 sm:$0xff]   ;;  %v3176_v12 = vld [vmem:[#allocation2 + $0x64] ss:$8 sps:$4 sm:$0xff]   ;;  %v3178_v14 = vld [vmem:[#allocation2 + $0x60] ss:$8 sps:$4 sm:$0xff]  }
  0x2b   :  { %v3208_v13 = vld [vmem:[%s4187_s0 + $0x4] ss:$28 sps:$4 sm:$0xff]   ;;  %v3179_v15 = vld [vmem:[#allocation2 + $0x74] ss:$8 sps:$4 sm:$0xff]   ;;  %v3181_v16 = vld [vmem:[#allocation2 + $0x70] ss:$8 sps:$4 sm:$0xff]  }
  0x2c   :  { %841 = vmatpush1.bf16.msra.mxu0 %v3163_v3  ;;  %870 = vmatprep.mubr.bf16.mxu0 %v3208_v13  ;;  %v3182_v17 = vld [vmem:[#allocation2 + $0x84] ss:$8 sps:$4 sm:$0xff]   ;;  %v3184_v18 = vld [vmem:[#allocation2 + $0x80] ss:$8 sps:$4 sm:$0xff]   ;;  %v3185_v19 = vld [vmem:[#allocation2 + $0x94] ss:$8 sps:$4 sm:$0xff]  }
  0x2d   :  { %842 = vmatprep.subr.bf16.mxu0 %v3164_v4  ;;  %v3187_v20 = vld [vmem:[#allocation2 + $0x90] ss:$8 sps:$4 sm:$0xff]   ;;  %v3188_v21 = vld [vmem:[#allocation2 + $0xa4] ss:$8 sps:$4 sm:$0xff]   ;;  %v3190_v22 = vld [vmem:[#allocation2 + $0xa0] ss:$8 sps:$4 sm:$0xff]  }
  0x2e   :  { %v3191_v23 = vld [vmem:[#allocation2 + $0xb4] ss:$8 sps:$4 sm:$0xff]   ;;  %v3193_v24 = vld [vmem:[#allocation2 + $0xb0] ss:$8 sps:$4 sm:$0xff]   ;;  %v3194_v25 = vld [vmem:[#allocation2 + $0xc4] ss:$8 sps:$4 sm:$0xff]  }
  0x2f   :  { %v3196_v26 = vld [vmem:[#allocation2 + $0xc0] ss:$8 sps:$4 sm:$0xff]   ;;  %v3197_v27 = vld [vmem:[#allocation2 + $0xd4] ss:$8 sps:$4 sm:$0xff]   ;;  %v3199_v28 = vld [vmem:[#allocation2 + $0xd0] ss:$8 sps:$4 sm:$0xff]  }
  0x30   :  { %843 = vmatpush1.bf16.msra.mxu0 %v3166_v5  ;;  %v3200_v29 = vld [vmem:[#allocation2 + $0xe4] ss:$8 sps:$4 sm:$0xff]   ;;  %v3202_v30 = vld [vmem:[#allocation2 + $0xe0] ss:$8 sps:$4 sm:$0xff]   ;;  %v3203_v31 = vld [vmem:[#allocation2 + $0xf4] ss:$8 sps:$4 sm:$0xff]  }
  0x31   :  { %844 = vmatprep.subr.bf16.mxu0 %v3167_v6  ;;  %v3205_v32 = vld [vmem:[#allocation2 + $0xf0] ss:$8 sps:$4 sm:$0xff]   ;;  %v3211_v33 = vld [vmem:[#allocation2 + $0x104] ss:$8 sps:$4 sm:$0xff]   ;;  %v3206_v34 = vld [vmem:[%s4187_s0] ss:$28 sps:$4 sm:$0xff]  }
  0x32   :  { %v3209_v35 = vld [vmem:[#allocation2 + $0x100] ss:$8 sps:$4 sm:$0xff]   ;;  %v3251_v36 = vld [vmem:[%s4187_s0 + $0x3c] ss:$28 sps:$4 sm:$0xff]   ;;  %v3217_v39 = vld [vmem:[#allocation2 + $0x124] ss:$8 sps:$4 sm:$0xff]  }
  0x33   :  { %v3214_v37 = vld [vmem:[#allocation2 + $0x114] ss:$8 sps:$4 sm:$0xff]   ;;  %v3212_v38 = vld [vmem:[#allocation2 + $0x110] ss:$8 sps:$4 sm:$0xff]   ;;  %v3215_v41 = vld [vmem:[#allocation2 + $0x120] ss:$8 sps:$4 sm:$0xff]  }
  0x34   :  { %845 = vmatpush1.bf16.msra.mxu0 %v3169_v7  ;;  %v3256_v40 = vld [vmem:[%s4187_s0 + $0x38] ss:$28 sps:$4 sm:$0xff]   ;;  %v3262_v42 = vld [vmem:[%s4187_s0 + $0xc] ss:$28 sps:$4 sm:$0xff]  }
  0x35   :  { %846 = vmatprep.subr.bf16.mxu0 %v3170_v8  ;;  %v3220_v43 = vld [vmem:[#allocation2 + $0x134] ss:$8 sps:$4 sm:$0xff]   ;;  %v3218_v44 = vld [vmem:[#allocation2 + $0x130] ss:$8 sps:$4 sm:$0xff]   ;;  %v3223_v45 = vld [vmem:[#allocation2 + $0x144] ss:$8 sps:$4 sm:$0xff]  }
  0x36   :  { %v3221_v46 = vld [vmem:[#allocation2 + $0x140] ss:$8 sps:$4 sm:$0xff]   ;;  %v3226_v47 = vld [vmem:[#allocation2 + $0x154] ss:$8 sps:$4 sm:$0xff]   ;;  %v3224_v48 = vld [vmem:[#allocation2 + $0x150] ss:$8 sps:$4 sm:$0xff]  }
  0x37   :  { %v3229_v49 = vld [vmem:[#allocation2 + $0x164] ss:$8 sps:$4 sm:$0xff]   ;;  %v3227_v50 = vld [vmem:[#allocation2 + $0x160] ss:$8 sps:$4 sm:$0xff]   ;;  %v3232_v51 = vld [vmem:[#allocation2 + $0x174] ss:$8 sps:$4 sm:$0xff]  }
  0x38   :  { %847 = vmatpush1.bf16.msra.mxu0 %v3172_v9  ;;  %v3230_v52 = vld [vmem:[#allocation2 + $0x170] ss:$8 sps:$4 sm:$0xff]   ;;  %v3235_v53 = vld [vmem:[#allocation2 + $0x184] ss:$8 sps:$4 sm:$0xff]   ;;  %v3233_v54 = vld [vmem:[#allocation2 + $0x180] ss:$8 sps:$4 sm:$0xff]  }
  0x39   :  { %848 = vmatprep.subr.bf16.mxu0 %v3173_v10  ;;  %v3238_v55 = vld [vmem:[#allocation2 + $0x194] ss:$8 sps:$4 sm:$0xff]   ;;  %v3236_v56 = vld [vmem:[#allocation2 + $0x190] ss:$8 sps:$4 sm:$0xff]   ;;  %v3241_v57 = vld [vmem:[#allocation2 + $0x1a4] ss:$8 sps:$4 sm:$0xff]  }
  0x3a   :  { %v3239_v58 = vld [vmem:[#allocation2 + $0x1a0] ss:$8 sps:$4 sm:$0xff]   ;;  %v3244_v59 = vld [vmem:[#allocation2 + $0x1b4] ss:$8 sps:$4 sm:$0xff]   ;;  %v3346_v60 = vld [vmem:[%s4191_s4 + $0x4] ss:$8 sps:$4 sm:$0xff]  }
  0x3b   :  { %v3348_v61 = vld [vmem:[%s4191_s4] ss:$8 sps:$4 sm:$0xff]   ;;  %v3349_v62 = vld [vmem:[%s4191_s4 + $0x14] ss:$8 sps:$4 sm:$0xff]   ;;  %v3242_v63 = vld [vmem:[#allocation2 + $0x1b0] ss:$8 sps:$4 sm:$0xff]   ;;  %1266 = vmatprep.subr.bf16.mxu1 %v3346_v60 }
  0x3c   :  { %849 = vmatpush1.bf16.msra.mxu0 %v3175_v11  ;;  %v3247_v0 = vld [vmem:[#allocation2 + $0x1c4] ss:$8 sps:$4 sm:$0xff]   ;;  %1267 = vmatpush1.bf16.msra.mxu1 %v3348_v61  ;;  %v3351_v1 = vld [vmem:[%s4191_s4 + $0x10] ss:$8 sps:$4 sm:$0xff]   ;;  %v3245_v3 = vld [vmem:[#allocation2 + $0x1c0] ss:$8 sps:$4 sm:$0xff]  }
  0x3d   :  { %850 = vmatprep.subr.bf16.mxu0 %v3176_v12  ;;  %1268 = vmatprep.subr.bf16.mxu1 %v3349_v62  ;;  %v3352_v2 = vld [vmem:[%s4191_s4 + $0x24] ss:$8 sps:$4 sm:$0xff]   ;;  %v3250_v4 = vld [vmem:[#allocation2 + $0x1d4] ss:$8 sps:$4 sm:$0xff]   ;;  %v3354_v5 = vld [vmem:[%s4191_s4 + $0x20] ss:$8 sps:$4 sm:$0xff]  }
  0x3e   :  { %v3248_v6 = vld [vmem:[#allocation2 + $0x1d0] ss:$8 sps:$4 sm:$0xff]   ;;  %v3255_v7 = vld [vmem:[#allocation2 + $0x1e4] ss:$8 sps:$4 sm:$0xff]   ;;  %v3355_v8 = vld [vmem:[%s4191_s4 + $0x34] ss:$8 sps:$4 sm:$0xff]  }
  0x3f   :  { %v3357_v9 = vld [vmem:[%s4191_s4 + $0x30] ss:$8 sps:$4 sm:$0xff]   ;;  %v3358_v10 = vld [vmem:[%s4191_s4 + $0x44] ss:$8 sps:$4 sm:$0xff]   ;;  %v3253_v11 = vld [vmem:[#allocation2 + $0x1e0] ss:$8 sps:$4 sm:$0xff]  }
  0x40   :  { %851 = vmatpush1.bf16.msra.mxu0 %v3178_v14  ;;  %1269 = vmatpush1.bf16.msra.mxu1 %v3351_v1  ;;  %v3259_v12 = vld [vmem:[#allocation2 + $0x1f4] ss:$8 sps:$4 sm:$0xff]   ;;  %v3360_v13 = vld [vmem:[%s4191_s4 + $0x40] ss:$8 sps:$4 sm:$0xff]   ;;  %v3301_v60 = vld [vmem:[#allocation2 + $0x2c4] ss:$8 sps:$4 sm:$0xff]  }
  0x41   :  { %852 = vmatprep.subr.bf16.mxu0 %v3179_v15  ;;  %1270 = vmatprep.subr.bf16.mxu1 %v3352_v2  ;;  %v3361_v14 = vld [vmem:[%s4191_s4 + $0x54] ss:$8 sps:$4 sm:$0xff]   ;;  %v3257_v15 = vld [vmem:[#allocation2 + $0x1f0] ss:$8 sps:$4 sm:$0xff]   ;;  %v3299_v61 = vld [vmem:[#allocation2 + $0x2c0] ss:$8 sps:$4 sm:$0xff]  }
  0x42   :  { %v3304_v62 = vld [vmem:[#allocation2 + $0x2d4] ss:$8 sps:$4 sm:$0xff]   ;;  %v3307_v1 = vld [vmem:[#allocation2 + $0x2e0] ss:$8 sps:$4 sm:$0xff]  }
  0x43   :  { %v3313_v2 = vld [vmem:[#allocation2 + $0x2f4] ss:$8 sps:$4 sm:$0xff]  }
  0x44   :  { %853 = vmatpush1.bf16.msra.mxu0 %v3181_v16  ;;  %1271 = vmatpush1.bf16.msra.mxu1 %v3354_v5  ;;  %v3265_v16 = vld [vmem:[#allocation2 + $0x204] ss:$8 sps:$4 sm:$0xff]  }
  0x45   :  { %854 = vmatprep.subr.bf16.mxu0 %v3182_v17  ;;  %1272 = vmatprep.subr.bf16.mxu1 %v3355_v8  ;;  %v3363_v17 = vld [vmem:[%s4191_s4 + $0x50] ss:$8 sps:$4 sm:$0xff]   ;;  %v3322_v8 = vld [vmem:[#allocation2 + $0x314] ss:$8 sps:$4 sm:$0xff]  }
  0x46   :  { %v3314_v5 = vld [vmem:[%s4187_s0 + $0x10] ss:$28 sps:$4 sm:$0xff]  }
  0x48   :  { %855 = vmatpush1.bf16.msra.mxu0 %v3184_v18  ;;  %1273 = vmatpush1.bf16.msra.mxu1 %v3357_v9  ;;  %v3260_v18 = vld [vmem:[%s4187_s0 + $0x8] ss:$28 sps:$4 sm:$0xff]   ;;  %v3320_v9 = vld [vmem:[#allocation2 + $0x310] ss:$8 sps:$4 sm:$0xff]  }
  0x49   :  { %856 = vmatprep.subr.bf16.mxu0 %v3185_v19  ;;  %1274 = vmatprep.subr.bf16.mxu1 %v3358_v10  ;;  %v3364_v19 = vld [vmem:[%s4191_s4 + $0x64] ss:$8 sps:$4 sm:$0xff]  }
  0x4a   :  { %v3325_v10 = vld [vmem:[#allocation2 + $0x324] ss:$8 sps:$4 sm:$0xff]  }
  0x4c   :  { %857 = vmatpush1.bf16.msra.mxu0 %v3187_v20  ;;  %v3263_v20 = vld [vmem:[#allocation2 + $0x200] ss:$8 sps:$4 sm:$0xff]   ;;  %1275 = vmatpush1.bf16.msra.mxu1 %v3360_v13  ;;  %v3328_v13 = vld [vmem:[#allocation2 + $0x334] ss:$8 sps:$4 sm:$0xff]  }
  0x4d   :  { %858 = vmatprep.subr.bf16.mxu0 %v3188_v21  ;;  %v3305_v21 = vld [vmem:[%s4187_s0 + $0x44] ss:$28 sps:$4 sm:$0xff]   ;;  %1276 = vmatprep.subr.bf16.mxu1 %v3361_v14  ;;  %v3326_v14 = vld [vmem:[#allocation2 + $0x330] ss:$8 sps:$4 sm:$0xff]  }
  0x50   :  { %859 = vmatpush1.bf16.msra.mxu0 %v3190_v22  ;;  %v3268_v22 = vld [vmem:[#allocation2 + $0x214] ss:$8 sps:$4 sm:$0xff]   ;;  %1277 = vmatpush1.bf16.msra.mxu1 %v3363_v17  ;;  %v3329_v17 = vld [vmem:[#allocation2 + $0x340] ss:$8 sps:$4 sm:$0xff]  }
  0x51   :  { %860 = vmatprep.subr.bf16.mxu0 %v3191_v23  ;;  %v3366_v23 = vld [vmem:[%s4191_s4 + $0x60] ss:$8 sps:$4 sm:$0xff]   ;;  %1278 = vmatprep.subr.bf16.mxu1 %v3364_v19  ;;  %v3332_v19 = vld [vmem:[#allocation2 + $0x350] ss:$8 sps:$4 sm:$0xff]  }
  0x54   :  { %861 = vmatpush1.bf16.msra.mxu0 %v3193_v24  ;;  %v3367_v24 = vld [vmem:[%s4191_s4 + $0x74] ss:$8 sps:$4 sm:$0xff]   ;;  %1279 = vmatpush1.bf16.msra.mxu1 %v3366_v23  ;;  %v3341_v23 = vld [vmem:[#allocation2 + $0x370] ss:$8 sps:$4 sm:$0xff]  }
  0x55   :  { %862 = vmatprep.subr.bf16.mxu0 %v3194_v25  ;;  %v3266_v25 = vld [vmem:[#allocation2 + $0x210] ss:$8 sps:$4 sm:$0xff]   ;;  %1280 = vmatprep.subr.bf16.mxu1 %v3367_v24 }
  0x56   :  { %v3344_v24 = vld [vmem:[%s4187_s0 + $0x18] ss:$28 sps:$4 sm:$0xff]  }
  0x58   :  { %863 = vmatpush1.bf16.msra.mxu0 %v3196_v26  ;;  %v3271_v26 = vld [vmem:[#allocation2 + $0x224] ss:$8 sps:$4 sm:$0xff]  }
  0x59   :  { %864 = vmatprep.subr.bf16.mxu0 %v3197_v27  ;;  %v3369_v27 = vld [vmem:[%s4191_s4 + $0x70] ss:$8 sps:$4 sm:$0xff]  }
  0x5a   :  { %1281 = vmatpush1.bf16.msra.mxu1 %v3369_v27  ;;  %v3388_v27 = vld [vmem:[%s4191_s4 + $0xe4] ss:$8 sps:$4 sm:$0xff]  }
  0x5c   :  { %865 = vmatpush1.bf16.msra.mxu0 %v3199_v28  ;;  %v3310_v28 = vld [vmem:[%s4187_s0 + $0x40] ss:$28 sps:$4 sm:$0xff]  }
  0x5d   :  { %866 = vmatprep.subr.bf16.mxu0 %v3200_v29  ;;  %v3370_v29 = vld [vmem:[%s4191_s4 + $0x84] ss:$8 sps:$4 sm:$0xff]  }
  0x5e   :  { %1282 = vmatprep.subr.bf16.mxu1 %v3370_v29  ;;  %v3391_v29 = vld [vmem:[%s4191_s4 + $0xf4] ss:$8 sps:$4 sm:$0xff]  }
  0x60   :  { %867 = vmatpush1.bf16.msra.mxu0 %v3202_v30  ;;  %v3269_v30 = vld [vmem:[#allocation2 + $0x220] ss:$8 sps:$4 sm:$0xff]  }
  0x61   :  { %868 = vmatprep.subr.bf16.mxu0 %v3203_v31  ;;  %v3316_v31 = vld [vmem:[%s4187_s0 + $0x14] ss:$28 sps:$4 sm:$0xff]  }
  0x64   :  { %869 = vmatpush1.bf16.msra.mxu0 %v3205_v32  ;;  %v3274_v32 = vld [vmem:[#allocation2 + $0x234] ss:$8 sps:$4 sm:$0xff]  }
  0x65   :  { %891 = vmatprep.subr.bf16.mxu0 %v3211_v33  ;;  %v3372_v33 = vld [vmem:[%s4191_s4 + $0x80] ss:$8 sps:$4 sm:$0xff]  }
  0x66   :  { %1283 = vmatpush1.bf16.msra.mxu1 %v3372_v33 }
  0x67   :  { %871 = vmatmul.mubr.bf16.vlgmr.msra.gmra.mrb[0].mxu0 %v3206_v34  ;;  %v3373_v34 = vld [vmem:[%s4191_s4 + $0x94] ss:$8 sps:$4 sm:$0xff]  }
  0x68   :  { %892 = vmatpush1.bf16.msra.mxu0 %v3209_v35  ;;  %880 = vmatprep.mubr.bf16.mxu0 %v3251_v36  ;;  %v3272_v35 = vld [vmem:[#allocation2 + $0x230] ss:$8 sps:$4 sm:$0xff]   ;;  %v3277_v36 = vld [vmem:[#allocation2 + $0x244] ss:$8 sps:$4 sm:$0xff]  }
  0x69   :  { %893 = vmatprep.subr.bf16.mxu0 %v3214_v37  ;;  %v3375_v37 = vld [vmem:[%s4191_s4 + $0x90] ss:$8 sps:$4 sm:$0xff]   ;;  %1284 = vmatprep.subr.bf16.mxu1 %v3373_v34 }
  0x6a   :  { %1285 = vmatpush1.bf16.msra.mxu1 %v3375_v37 }
  0x6c   :  { %894 = vmatpush1.bf16.msra.mxu0 %v3212_v38  ;;  %v3376_v38 = vld [vmem:[%s4191_s4 + $0xa4] ss:$8 sps:$4 sm:$0xff]  }
  0x6d   :  { %895 = vmatprep.subr.bf16.mxu0 %v3217_v39  ;;  %v3275_v39 = vld [vmem:[#allocation2 + $0x240] ss:$8 sps:$4 sm:$0xff]   ;;  %1286 = vmatprep.subr.bf16.mxu1 %v3376_v38 }
  0x6f   :  { %881 = vmatmul.mubr.bf16.gmra.mrb[4].mxu0 %v3256_v40  ;;  %v3280_v40 = vld [vmem:[#allocation2 + $0x254] ss:$8 sps:$4 sm:$0xff]  }
  0x70   :  { %896 = vmatpush1.bf16.msra.mxu0 %v3215_v41  ;;  %923 = vmatprep.mubr.bf16.mxu0 %v3262_v42  ;;  %v3378_v41 = vld [vmem:[%s4191_s4 + $0xa0] ss:$8 sps:$4 sm:$0xff]   ;;  %v3379_v42 = vld [vmem:[%s4191_s4 + $0xb4] ss:$8 sps:$4 sm:$0xff]  }
  0x71   :  { %897 = vmatprep.subr.bf16.mxu0 %v3220_v43  ;;  %v3278_v43 = vld [vmem:[#allocation2 + $0x250] ss:$8 sps:$4 sm:$0xff]   ;;  %1287 = vmatpush1.bf16.msra.mxu1 %v3378_v41 }
  0x72   :  { %1288 = vmatprep.subr.bf16.mxu1 %v3379_v42 }
  0x74   :  { %898 = vmatpush1.bf16.msra.mxu0 %v3218_v44  ;;  %v3283_v44 = vld [vmem:[#allocation2 + $0x264] ss:$8 sps:$4 sm:$0xff]  }
  0x75   :  { %899 = vmatprep.subr.bf16.mxu0 %v3223_v45  ;;  %v3381_v45 = vld [vmem:[%s4191_s4 + $0xb0] ss:$8 sps:$4 sm:$0xff]  }
  0x76   :  { %1289 = vmatpush1.bf16.msra.mxu1 %v3381_v45 }
  0x78   :  { %900 = vmatpush1.bf16.msra.mxu0 %v3221_v46  ;;  %v3382_v46 = vld [vmem:[%s4191_s4 + $0xc4] ss:$8 sps:$4 sm:$0xff]  }
  0x79   :  { %901 = vmatprep.subr.bf16.mxu0 %v3226_v47  ;;  %v3281_v47 = vld [vmem:[#allocation2 + $0x260] ss:$8 sps:$4 sm:$0xff]   ;;  %1290 = vmatprep.subr.bf16.mxu1 %v3382_v46 }
  0x7c   :  { %902 = vmatpush1.bf16.msra.mxu0 %v3224_v48  ;;  %v3286_v48 = vld [vmem:[#allocation2 + $0x274] ss:$8 sps:$4 sm:$0xff]  }
  0x7d   :  { %903 = vmatprep.subr.bf16.mxu0 %v3229_v49  ;;  %v3384_v49 = vld [vmem:[%s4191_s4 + $0xc0] ss:$8 sps:$4 sm:$0xff]  }
  0x7e   :  { %1291 = vmatpush1.bf16.msra.mxu1 %v3384_v49 }
  0x80   :  { %904 = vmatpush1.bf16.msra.mxu0 %v3227_v50  ;;  %v3385_v50 = vld [vmem:[%s4191_s4 + $0xd4] ss:$8 sps:$4 sm:$0xff]  }
  0x81   :  { %905 = vmatprep.subr.bf16.mxu0 %v3232_v51  ;;  %v3284_v51 = vld [vmem:[#allocation2 + $0x270] ss:$8 sps:$4 sm:$0xff]   ;;  %1292 = vmatprep.subr.bf16.mxu1 %v3385_v50 }
  0x84   :  { %906 = vmatpush1.bf16.msra.mxu0 %v3230_v52  ;;  %v3289_v52 = vld [vmem:[#allocation2 + $0x284] ss:$8 sps:$4 sm:$0xff]  }
  0x85   :  { %907 = vmatprep.subr.bf16.mxu0 %v3235_v53  ;;  %v3287_v53 = vld [vmem:[#allocation2 + $0x280] ss:$8 sps:$4 sm:$0xff]  }
  0x88   :  { %908 = vmatpush1.bf16.msra.mxu0 %v3233_v54  ;;  %v3292_v54 = vld [vmem:[#allocation2 + $0x294] ss:$8 sps:$4 sm:$0xff]  }
  0x89   :  { %909 = vmatprep.subr.bf16.mxu0 %v3238_v55  ;;  %v3290_v55 = vld [vmem:[#allocation2 + $0x290] ss:$8 sps:$4 sm:$0xff]  }
  0x8c   :  { %910 = vmatpush1.bf16.msra.mxu0 %v3236_v56  ;;  %v3295_v56 = vld [vmem:[#allocation2 + $0x2a4] ss:$8 sps:$4 sm:$0xff]  }
  0x8d   :  { %911 = vmatprep.subr.bf16.mxu0 %v3241_v57  ;;  %v3293_v57 = vld [vmem:[#allocation2 + $0x2a0] ss:$8 sps:$4 sm:$0xff]  }
  0x90   :  { %912 = vmatpush1.bf16.msra.mxu0 %v3239_v58  ;;  %v3298_v58 = vld [vmem:[#allocation2 + $0x2b4] ss:$8 sps:$4 sm:$0xff]  }
  0x91   :  { %913 = vmatprep.subr.bf16.mxu0 %v3244_v59  ;;  %v3296_v59 = vld [vmem:[#allocation2 + $0x2b0] ss:$8 sps:$4 sm:$0xff]  }
  0x94   :  { %914 = vmatpush1.bf16.msra.mxu0 %v3242_v63  ;;  %v3302_v63 = vld [vmem:[#allocation2 + $0x2d0] ss:$8 sps:$4 sm:$0xff]  }
  0x95   :  { %915 = vmatprep.subr.bf16.mxu0 %v3247_v0  ;;  %v3309_v0 = vld [vmem:[#allocation2 + $0x2e4] ss:$8 sps:$4 sm:$0xff]  }
  0x98   :  { %916 = vmatpush1.bf16.msra.mxu0 %v3245_v3  ;;  %v3311_v3 = vld [vmem:[#allocation2 + $0x2f0] ss:$8 sps:$4 sm:$0xff]  }
  0x99   :  { %917 = vmatprep.subr.bf16.mxu0 %v3250_v4  ;;  %v3319_v4 = vld [vmem:[#allocation2 + $0x304] ss:$8 sps:$4 sm:$0xff]  }
  0x9c   :  { %918 = vmatpush1.bf16.msra.mxu0 %v3248_v6  ;;  %v3317_v6 = vld [vmem:[#allocation2 + $0x300] ss:$8 sps:$4 sm:$0xff]  }
  0x9d   :  { %919 = vmatprep.subr.bf16.mxu0 %v3255_v7  ;;  %v3335_v7 = vld [vmem:[%s4187_s0 + $0x4c] ss:$28 sps:$4 sm:$0xff]  }
  0xa0   :  { %920 = vmatpush1.bf16.msra.mxu0 %v3253_v11  ;;  %v3337_v11 = vld [vmem:[%s4187_s0 + $0x48] ss:$28 sps:$4 sm:$0xff]  }
  0xa1   :  { %921 = vmatprep.subr.bf16.mxu0 %v3259_v12  ;;  %v3323_v12 = vld [vmem:[#allocation2 + $0x320] ss:$8 sps:$4 sm:$0xff]  }
  0xa4   :  { %922 = vmatpush1.bf16.msra.mxu0 %v3257_v15  ;;  %v3744_v15 = vmov 0  }
  0xa5   :  { %944 = vmatprep.subr.bf16.mxu0 %v3265_v16  ;;  %v3331_v16 = vld [vmem:[#allocation2 + $0x344] ss:$8 sps:$4 sm:$0xff]  }
  0xa7   :  { %924 = vmatmul.mubr.bf16.vlgmr.msra.gmra.mrb[0].mxu0 %v3260_v18  ;;  %v3334_v18 = vld [vmem:[#allocation2 + $0x354] ss:$8 sps:$4 sm:$0xff]  }
  0xa8   :  { %945 = vmatpush1.bf16.msra.mxu0 %v3263_v20  ;;  %933 = vmatprep.mubr.bf16.mxu0 %v3305_v21  ;;  %v3340_v20 = vld [vmem:[#allocation2 + $0x364] ss:$8 sps:$4 sm:$0xff]   ;;  %v3338_v21 = vld [vmem:[#allocation2 + $0x360] ss:$8 sps:$4 sm:$0xff]  }
  0xa9   :  { %946 = vmatprep.subr.bf16.mxu0 %v3268_v22  ;;  %v3343_v22 = vld [vmem:[#allocation2 + $0x374] ss:$8 sps:$4 sm:$0xff]  }
  0xac   :  { %947 = vmatpush1.bf16.msra.mxu0 %v3266_v25  ;;  %v3345_v25 = vld [vmem:[%s4187_s0 + $0x50] ss:$28 sps:$4 sm:$0xff]  }
  0xad   :  { %948 = vmatprep.subr.bf16.mxu0 %v3271_v26  ;;  %v3387_v26 = vld [vmem:[%s4191_s4 + $0xd0] ss:$8 sps:$4 sm:$0xff]  }
  0xae   :  { %1293 = vmatpush1.bf16.msra.mxu1 %v3387_v26  ;;  %v3441_v26 = vld [vmem:[#allocation4 + $0xbc] ss:$28 sps:$4 sm:$0xff]  }
  0xaf   :  { %934 = vmatmul.mubr.bf16.gmra.mrb[4].mxu0 %v3310_v28  ;;  %v3390_v28 = vld [vmem:[%s4191_s4 + $0xe0] ss:$8 sps:$4 sm:$0xff]   ;;  %1294 = vmatprep.subr.bf16.mxu1 %v3388_v27  ;;  %v3439_v27 = vld [vmem:[#allocation4 + $0xb8] ss:$28 sps:$4 sm:$0xff]  }
  0xb0   :  { %949 = vmatpush1.bf16.msra.mxu0 %v3269_v30  ;;  %976 = vmatprep.mubr.bf16.mxu0 %v3316_v31  ;;  %v3393_v30 = vld [vmem:[%s4191_s4 + $0xf0] ss:$8 sps:$4 sm:$0xff]   ;;  %v3396_v31 = vld [vmem:[%s4193_s6 + $0x4] ss:$8 sps:$4 sm:$0xff]  }
  0xb1   :  { %950 = vmatprep.subr.bf16.mxu0 %v3274_v32  ;;  %v196_v32 = vlaneseq }
  0xb2   :  { %1295 = vmatpush1.bf16.msra.mxu1 %v3390_v28  ;;  %v3447_v28 = vld [vmem:[#allocation4 + $0xf4] ss:$28 sps:$4 sm:$0xff]  }
  0xb3   :  { %1296 = vmatprep.subr.bf16.mxu1 %v3391_v29  ;;  %v3972_v33 = vshrl.u32 %v196_v32, 7  ;;  %v3445_v29 = vld [vmem:[#allocation4 + $0xf0] ss:$28 sps:$4 sm:$0xff]   ;;  %v3459_v32 = vld [vmem:[#allocation4 + $0x164] ss:$28 sps:$4 sm:$0xff]  }
  0xb4   :  { %951 = vmatpush1.bf16.msra.mxu0 %v3272_v35  ;;  %v194_v35 = vld [vmem:[%s4190_s3] sm:$0x3] }
  0xb5   :  { %952 = vmatprep.subr.bf16.mxu0 %v3277_v36  ;;  %v3975_v34 = vsub.s32 0, %v3972_v33  ;;  %v3981_v36 = vsub.s32 1, %v3972_v33 }
  0xb6   :  { %1297 = vmatpush1.bf16.msra.mxu1 %v3393_v30  ;;  %v3453_v30 = vld [vmem:[#allocation4 + $0x12c] ss:$28 sps:$4 sm:$0xff]  }
  0xb7   :  { %1449 = vmatprep.subr.bf16.mxu1 %v3396_v31  ;;  %v199_v37 = vrot.slane %v194_v35, %v3975_v34  ;;  %v203_v38 = vrot.slane %v194_v35, %v3981_v36  ;;  %v3451_v31 = vld [vmem:[#allocation4 + $0x128] ss:$28 sps:$4 sm:$0xff]   ;;  %v3457_v35 = vld [vmem:[#allocation4 + $0x160] ss:$28 sps:$4 sm:$0xff]  }
  0xb8   :  { %953 = vmatpush1.bf16.msra.mxu0 %v3275_v39 }
  0xb9   :  { %954 = vmatprep.subr.bf16.mxu0 %v3280_v40 }
  0xbc   :  { %955 = vmatpush1.bf16.msra.mxu0 %v3278_v43 }
  0xbd   :  { %956 = vmatprep.subr.bf16.mxu0 %v3283_v44 }
  0xc0   :  { %957 = vmatpush1.bf16.msra.mxu0 %v3281_v47 }
  0xc1   :  { %958 = vmatprep.subr.bf16.mxu0 %v3286_v48 }
  0xc4   :  { %959 = vmatpush1.bf16.msra.mxu0 %v3284_v51 }
  0xc5   :  { %960 = vmatprep.subr.bf16.mxu0 %v3289_v52 }
  0xc8   :  { %961 = vmatpush1.bf16.msra.mxu0 %v3287_v53 }
  0xc9   :  { %962 = vmatprep.subr.bf16.mxu0 %v3292_v54  ;;  %v3394_v54 = vld [vmem:[%s4193_s6] ss:$8 sps:$4 sm:$0xff]  }
  0xcc   :  { %963 = vmatpush1.bf16.msra.mxu0 %v3290_v55 }
  0xcd   :  { %964 = vmatprep.subr.bf16.mxu0 %v3295_v56 }
  0xd0   :  { %965 = vmatpush1.bf16.msra.mxu0 %v3293_v57  ;;  %v3399_v57 = vld [vmem:[%s4193_s6 + $0x14] ss:$8 sps:$4 sm:$0xff]  }
  0xd1   :  { %966 = vmatprep.subr.bf16.mxu0 %v3298_v58 }
  0xd4   :  { %967 = vmatpush1.bf16.msra.mxu0 %v3296_v59 }
  0xd5   :  { %968 = vmatprep.subr.bf16.mxu0 %v3301_v60 }
  0xd8   :  { %969 = vmatpush1.bf16.msra.mxu0 %v3299_v61 }
  0xd9   :  { %970 = vmatprep.subr.bf16.mxu0 %v3304_v62 }
  0xdc   :  { %971 = vmatpush1.bf16.msra.mxu0 %v3302_v63  ;;  %v3397_v63 = vld [vmem:[%s4193_s6 + $0x10] ss:$8 sps:$4 sm:$0xff]  }
  0xdd   :  { %972 = vmatprep.subr.bf16.mxu0 %v3309_v0 }
  0xe0   :  { %973 = vmatpush1.bf16.msra.mxu0 %v3307_v1 }
  0xe1   :  { %974 = vmatprep.subr.bf16.mxu0 %v3313_v2  ;;  %v3402_v2 = vld [vmem:[%s4193_s6 + $0x24] ss:$8 sps:$4 sm:$0xff]  }
  0xe4   :  { %975 = vmatpush1.bf16.msra.mxu0 %v3311_v3 }
  0xe5   :  { %997 = vmatprep.subr.bf16.mxu0 %v3319_v4 }
  0xe7   :  { %977 = vmatmul.mubr.bf16.vlgmr.msra.gmra.mrb[0].mxu0 %v3314_v5 }
  0xe8   :  { %998 = vmatpush1.bf16.msra.mxu0 %v3317_v6  ;;  %986 = vmatprep.mubr.bf16.mxu0 %v3335_v7  ;;  %v3400_v7 = vld [vmem:[%s4193_s6 + $0x20] ss:$8 sps:$4 sm:$0xff]  }
  0xe9   :  { %999 = vmatprep.subr.bf16.mxu0 %v3322_v8  ;;  %v3405_v8 = vld [vmem:[%s4193_s6 + $0x34] ss:$8 sps:$4 sm:$0xff]  }
  0xec   :  { %1000 = vmatpush1.bf16.msra.mxu0 %v3320_v9  ;;  %v3403_v9 = vld [vmem:[%s4193_s6 + $0x30] ss:$8 sps:$4 sm:$0xff]  }
  0xed   :  { %1001 = vmatprep.subr.bf16.mxu0 %v3325_v10  ;;  %v3408_v10 = vld [vmem:[%s4193_s6 + $0x44] ss:$8 sps:$4 sm:$0xff]  }
  0xef   :  { %987 = vmatmul.mubr.bf16.gmra.mrb[4].mxu0 %v3337_v11  ;;  %v3406_v11 = vld [vmem:[%s4193_s6 + $0x40] ss:$8 sps:$4 sm:$0xff]  }
  0xf0   :  { %1002 = vmatpush1.bf16.msra.mxu0 %v3323_v12  ;;  %1029 = vmatprep.mubr.bf16.mxu0 %v3744_v15  ;;  %v3411_v12 = vld [vmem:[%s4193_s6 + $0x54] ss:$8 sps:$4 sm:$0xff]  }
  0xf1   :  { %1003 = vmatprep.subr.bf16.mxu0 %v3328_v13  ;;  %v3409_v13 = vld [vmem:[%s4193_s6 + $0x50] ss:$8 sps:$4 sm:$0xff]  }
  0xf4   :  { %1004 = vmatpush1.bf16.msra.mxu0 %v3326_v14  ;;  %v3414_v14 = vld [vmem:[%s4193_s6 + $0x64] ss:$8 sps:$4 sm:$0xff]  }
  0xf5   :  { %1005 = vmatprep.subr.bf16.mxu0 %v3331_v16  ;;  %v3412_v16 = vld [vmem:[%s4193_s6 + $0x60] ss:$8 sps:$4 sm:$0xff]  }
  0xf8   :  { %1006 = vmatpush1.bf16.msra.mxu0 %v3329_v17  ;;  %v3417_v17 = vld [vmem:[%s4193_s6 + $0x74] ss:$8 sps:$4 sm:$0xff]  }
  0xf9   :  { %1007 = vmatprep.subr.bf16.mxu0 %v3334_v18  ;;  %v3415_v18 = vld [vmem:[%s4193_s6 + $0x70] ss:$8 sps:$4 sm:$0xff]  }
  0xfc   :  { %1008 = vmatpush1.bf16.msra.mxu0 %v3332_v19  ;;  %v3420_v19 = vld [vmem:[#allocation4 + $0x4] ss:$28 sps:$4 sm:$0xff]  }
  0xfd   :  { %1009 = vmatprep.subr.bf16.mxu0 %v3340_v20  ;;  %v3421_v20 = vld [vmem:[#allocation4 + $0x10] ss:$28 sps:$4 sm:$0xff]  }
 0x100   :  { %1010 = vmatpush1.bf16.msra.mxu0 %v3338_v21  ;;  %v3423_v21 = vld [vmem:[#allocation4 + $0x14] ss:$28 sps:$4 sm:$0xff]  }
 0x101   :  { %1011 = vmatprep.subr.bf16.mxu0 %v3343_v22  ;;  %v3429_v22 = vld [vmem:[#allocation4 + $0x4c] ss:$28 sps:$4 sm:$0xff]  }
 0x104   :  { %1012 = vmatpush1.bf16.msra.mxu0 %v3341_v23  ;;  %v3427_v23 = vld [vmem:[#allocation4 + $0x48] ss:$28 sps:$4 sm:$0xff]  }
 0x105   :  { %2361 = vmatprep.subr.bf16.mxu0 %v3423_v21 }
 0x107   :  { %1030 = vmatmul.mubr.bf16.vlgmr.msra.gmra.mrb[0].mxu0 %v3344_v24  ;;  %v3435_v24 = vld [vmem:[#allocation4 + $0x84] ss:$28 sps:$4 sm:$0xff]  }
 0x108   :  { %1039 = vmatprep.mubr.bf16.mxu0 %v3744_v15  ;;  %2362 = vmatpush1.bf16.msra.mxu0 %v3421_v20 }
 0x109   :  { %2363 = vmatprep.subr.bf16.mxu0 %v3429_v22  ;;  %v3432_v22 = vld [vmem:[#allocation4 + $0x74] ss:$28 sps:$4 sm:$0xff]  }
 0x10c   :  { %2364 = vmatpush1.bf16.msra.mxu0 %v3427_v23 }
 0x10d   :  { %2365 = vmatprep.subr.bf16.mxu0 %v3435_v24  ;;  %v3430_v24 = vld [vmem:[#allocation4 + $0x70] ss:$28 sps:$4 sm:$0xff]  }
 0x10f   :  { %1040 = vmatmul.mubr.bf16.gmra.mrb[4].mxu0 %v3345_v25  ;;  %v3433_v25 = vld [vmem:[#allocation4 + $0x80] ss:$28 sps:$4 sm:$0xff]  }
 0x110   :  { %2366 = vmatpush1.bf16.msra.mxu0 %v3433_v25 }
 0x111   :  { %2367 = vmatprep.subr.bf16.mxu0 %v3441_v26  ;;  %v3438_v26 = vld [vmem:[#allocation4 + $0xac] ss:$28 sps:$4 sm:$0xff]  }
 0x114   :  { %2368 = vmatpush1.bf16.msra.mxu0 %v3439_v27  ;;  %v3436_v27 = vld [vmem:[#allocation4 + $0xa8] ss:$28 sps:$4 sm:$0xff]  }
 0x115   :  { %2369 = vmatprep.subr.bf16.mxu0 %v3447_v28  ;;  %v3442_v28 = vld [vmem:[#allocation4 + $0xe0] ss:$28 sps:$4 sm:$0xff]  }
 0x118   :  { %2370 = vmatpush1.bf16.msra.mxu0 %v3445_v29  ;;  %v3450_v29 = vld [vmem:[#allocation4 + $0x11c] ss:$28 sps:$4 sm:$0xff]  }
 0x119   :  { %2371 = vmatprep.subr.bf16.mxu0 %v3453_v30  ;;  %v3448_v30 = vld [vmem:[#allocation4 + $0x118] ss:$28 sps:$4 sm:$0xff]  }
 0x11c   :  { %2372 = vmatpush1.bf16.msra.mxu0 %v3451_v31  ;;  %v3456_v31 = vld [vmem:[#allocation4 + $0x154] ss:$28 sps:$4 sm:$0xff]  }
 0x11d   :  { %2373 = vmatprep.subr.bf16.mxu0 %v3459_v32  ;;  %v3454_v32 = vld [vmem:[#allocation4 + $0x150] ss:$28 sps:$4 sm:$0xff]  }
 0x120   :  { %2374 = vmatpush1.bf16.msra.mxu0 %v3457_v35  ;;  %v3462_v35 = vld [vmem:[#allocation4 + $0x18c] ss:$28 sps:$4 sm:$0xff]  }
 0x1da   :  { %v1031_v39 = vpop.f32.mrb[0].mxu0 }
 0x1db   :  { %v3119_v40 = vadd.f32 %v1031_v39, %v199_v37  ;;  %v1033_v41 = vpop.f32.mrb[1].mxu0  ;;  %v3471_v39 = vld [vmem:[#allocation4 + $0x1d4] ss:$28 sps:$4 sm:$0xff]  }
 0x1dc   :  { %v3120_v42 = vadd.f32 %v1033_v41, %v203_v38  ;;  %v1035_v43 = vpop.f32.mrb[2].mxu0  ;;  %v3477_v41 = vld [vmem:[#allocation4 + $0x20c] ss:$28 sps:$4 sm:$0xff]  }
 0x1dd   :  { %v3121_v44 = vadd.f32 %v1035_v43, %v199_v37  ;;  %v1037_v45 = vpop.f32.mrb[3].mxu0  ;;  %v1050_v47 = vmax.f32 %v3119_v40, 0.0  ;;  %v3469_v40 = vld [vmem:[#allocation4 + $0x1d0] ss:$28 sps:$4 sm:$0xff]   ;;  %v3483_v43 = vld [vmem:[#allocation4 + $0x244] ss:$28 sps:$4 sm:$0xff]  }
 0x1de   :  { %v3122_v46 = vadd.f32 %v1037_v45, %v203_v38  ;;  %v1051_v49 = vmax.f32 %v3120_v42, 0.0  ;;  %v3475_v42 = vld [vmem:[#allocation4 + $0x208] ss:$28 sps:$4 sm:$0xff]   ;;  %v3489_v45 = vld [vmem:[#allocation4 + $0x27c] ss:$28 sps:$4 sm:$0xff]  }
 0x1df   :  { %v1052_v48 = vmax.f32 %v3121_v44, 0.0  ;;  %v3481_v44 = vld [vmem:[#allocation4 + $0x240] ss:$28 sps:$4 sm:$0xff]  }
 0x1e0   :  { %v1053_v50 = vmax.f32 %v3122_v46, 0.0  ;;  %v3487_v46 = vld [vmem:[#allocation4 + $0x278] ss:$28 sps:$4 sm:$0xff]  }
 0x1e1   :  { %v1058_v51 = vpack.c.bf16 %v1052_v48, %v1050_v47  ;;  %v3495_v47 = vld [vmem:[#allocation4 + $0x2b4] ss:$28 sps:$4 sm:$0xff]  }
 0x1e2   :  { %v1041_v52 = vpop.f32.mrb[4].mxu0  ;;  %v1059_v53 = vpack.c.bf16 %v1053_v50, %v1051_v49  ;;  %v3493_v48 = vld [vmem:[#allocation4 + $0x2b0] ss:$28 sps:$4 sm:$0xff]   ;;  %v3499_v50 = vld [vmem:[#allocation4 + $0x2e8] ss:$28 sps:$4 sm:$0xff]  }
 0x1e3   :  { %v3123_v55 = vadd.f32 %v1041_v52, %v199_v37  ;;  %v1043_v56 = vpop.f32.mrb[5].mxu0  ;;  %v3501_v49 = vld [vmem:[#allocation4 + $0x2ec] ss:$28 sps:$4 sm:$0xff]  }
 0x1e4   :  { %v3124_v58 = vadd.f32 %v1043_v56, %v203_v38  ;;  %v1045_v59 = vpop.f32.mrb[6].mxu0  ;;  %1298 = vmatprep.mubr.bf16.mxu1 %v1059_v53 }
 0x1e5   :  { %v3125_v60 = vadd.f32 %v1045_v59, %v199_v37  ;;  %v1047_v61 = vpop.f32.mrb[7].mxu0  ;;  %1299 = vmatmul.mubr.bf16.vlgmr.msra.gmra.mrb[0].mxu1 %v1058_v51  ;;  %v1054_v0 = vmax.f32 %v3123_v55, 0.0  ;;  %v3465_v37 = vld [vmem:[#allocation4 + $0x19c] ss:$28 sps:$4 sm:$0xff]   ;;  %v1094_v51 = vld [vmem:[%s4192_s5] sm:$0x3] }
 0x1e6   :  { %v3126_v62 = vadd.f32 %v1047_v61, %v203_v38  ;;  %1450 = vmatpush1.bf16.msra.mxu1 %v3394_v54  ;;  %v1055_v3 = vmax.f32 %v3124_v58, 0.0  ;;  %v3463_v38 = vld [vmem:[#allocation4 + $0x198] ss:$28 sps:$4 sm:$0xff]   ;;  %2375 = vmatprep.subr.bf16.mxu0 %v3465_v37  ;;  %v1099_v52 = vrot.slane %v1094_v51, %v3975_v34  ;;  %v1103_v53 = vrot.slane %v1094_v51, %v3981_v36  ;;  %v3460_v37 = vld [vmem:[#allocation4 + $0x188] ss:$28 sps:$4 sm:$0xff]  }
 0x1e7   :  { %v1056_v1 = vmax.f32 %v3125_v60, 0.0  ;;  %1451 = vmatprep.subr.bf16.mxu1 %v3399_v57  ;;  %2376 = vmatpush1.bf16.msra.mxu0 %v3463_v38  ;;  %v1327_v57 = vld [vmem:[%s4188_s1] sm:$0xff]  ;;  %v3502_v51 = vld [vmem:[#allocation4 + $0x310] ss:$28 sps:$4 sm:$0xff]  }
 0x1e8   :  { %v1057_v4 = vmax.f32 %v3126_v62, 0.0  ;;  %2377 = vmatprep.subr.bf16.mxu0 %v3471_v39  ;;  %v1328_v62 = vld [vmem:[%s4188_s1 + $0x8] sm:$0xff]  ;;  %v3468_v38 = vld [vmem:[#allocation4 + $0x1c4] ss:$28 sps:$4 sm:$0xff]  }
 0x1e9   :  { %v1060_v5 = vpack.c.bf16 %v1056_v1, %v1054_v0  ;;  %v3466_v39 = vld [vmem:[#allocation4 + $0x1c0] ss:$28 sps:$4 sm:$0xff]  }
 0x1ea   :  { %v1061_v6 = vpack.c.bf16 %v1057_v4, %v1055_v3  ;;  %1452 = vmatpush1.bf16.msra.mxu1 %v3397_v63 }
 0x1eb   :  { %1453 = vmatprep.subr.bf16.mxu1 %v3402_v2  ;;  %2378 = vmatpush1.bf16.msra.mxu0 %v3469_v40  ;;  %v3474_v40 = vld [vmem:[#allocation4 + $0x1fc] ss:$28 sps:$4 sm:$0xff]  }
 0x1ec   :  { %1308 = vmatprep.mubr.bf16.mxu1 %v1061_v6  ;;  %2379 = vmatprep.subr.bf16.mxu0 %v3477_v41  ;;  %v3472_v41 = vld [vmem:[#allocation4 + $0x1f8] ss:$28 sps:$4 sm:$0xff]  }
 0x1ed   :  { %1309 = vmatmul.mubr.bf16.gmra.mrb[4].mxu1 %v1060_v5 }
 0x1ee   :  { %1454 = vmatpush1.bf16.msra.mxu1 %v3400_v7  ;;  %1481 = vmatprep.mubr.bf16.mxu1 %v3744_v15  ;;  %v1329_v7 = vld [vmem:[%s4188_s1 + $0x10] sm:$0xff] }
 0x1ef   :  { %1455 = vmatprep.subr.bf16.mxu1 %v3405_v8  ;;  %2380 = vmatpush1.bf16.msra.mxu0 %v3475_v42  ;;  %v3418_v8 = vld [vmem:[#allocation4] ss:$28 sps:$4 sm:$0xff]   ;;  %v3480_v42 = vld [vmem:[#allocation4 + $0x234] ss:$28 sps:$4 sm:$0xff]  }
 0x1f0   :  { %2381 = vmatprep.subr.bf16.mxu0 %v3483_v43  ;;  %v3478_v43 = vld [vmem:[#allocation4 + $0x230] ss:$28 sps:$4 sm:$0xff]  }
 0x1f2   :  { %1456 = vmatpush1.bf16.msra.mxu1 %v3403_v9 }
 0x1f3   :  { %1457 = vmatprep.subr.bf16.mxu1 %v3408_v10  ;;  %2382 = vmatpush1.bf16.msra.mxu0 %v3481_v44  ;;  %v3486_v44 = vld [vmem:[#allocation4 + $0x26c] ss:$28 sps:$4 sm:$0xff]  }
 0x1f4   :  { %2383 = vmatprep.subr.bf16.mxu0 %v3489_v45  ;;  %v3484_v45 = vld [vmem:[#allocation4 + $0x268] ss:$28 sps:$4 sm:$0xff]  }
 0x1f6   :  { %1458 = vmatpush1.bf16.msra.mxu1 %v3406_v11 }
 0x1f7   :  { %1459 = vmatprep.subr.bf16.mxu1 %v3411_v12  ;;  %2384 = vmatpush1.bf16.msra.mxu0 %v3487_v46  ;;  %v3426_v12 = vld [vmem:[#allocation4 + $0x3c] ss:$28 sps:$4 sm:$0xff]   ;;  %v3492_v46 = vld [vmem:[#allocation4 + $0x2a4] ss:$28 sps:$4 sm:$0xff]  }
 0x1f8   :  { %2385 = vmatprep.subr.bf16.mxu0 %v3495_v47  ;;  %v3490_v47 = vld [vmem:[#allocation4 + $0x2a0] ss:$28 sps:$4 sm:$0xff]  }
 0x1fa   :  { %1460 = vmatpush1.bf16.msra.mxu1 %v3409_v13 }
 0x1fb   :  { %1461 = vmatprep.subr.bf16.mxu1 %v3414_v14  ;;  %2386 = vmatpush1.bf16.msra.mxu0 %v3493_v48  ;;  %v3498_v48 = vld [vmem:[#allocation4 + $0x2dc] ss:$28 sps:$4 sm:$0xff]  }
 0x1fc   :  { %2387 = vmatprep.subr.bf16.mxu0 %v3501_v49  ;;  %v3496_v49 = vld [vmem:[#allocation4 + $0x2d8] ss:$28 sps:$4 sm:$0xff]  }
 0x1fe   :  { %1462 = vmatpush1.bf16.msra.mxu1 %v3412_v16  ;;  %v1330_v16 = vld [vmem:[%s4188_s1 + $0x18] sm:$0xff] }
 0x1ff   :  { %1463 = vmatprep.subr.bf16.mxu1 %v3417_v17  ;;  %2388 = vmatpush1.bf16.msra.mxu0 %v3499_v50  ;;  %v3504_v50 = vld [vmem:[#allocation4 + $0x314] ss:$28 sps:$4 sm:$0xff]  }
 0x202   :  { %1464 = vmatpush1.bf16.msra.mxu1 %v3415_v18 }
 0x203   :  { %2255 = vmatprep.subr.bf16.mxu1 %v3420_v19  ;;  %v3424_v19 = vld [vmem:[#allocation4 + $0x38] ss:$28 sps:$4 sm:$0xff]  }
 0x2b8   :  { %v1300_v54 = vpop.f32.mrb[0].mxu1 }
 0x2b9   :  { %v1301_v55 = vadd.f32 %v1300_v54, %v1099_v52  ;;  %v1302_v56 = vpop.f32.mrb[1].mxu1  ;;  %v3510_v54 = vld [vmem:[#allocation4 + $0x34c] ss:$28 sps:$4 sm:$0xff]  }
 0x2ba   :  { %v1303_v58 = vadd.f32 %v1302_v56, %v1103_v53  ;;  %v1304_v59 = vpop.f32.mrb[2].mxu1  ;;  %v3513_v56 = vld [vmem:[#allocation4 + $0x35c] ss:$28 sps:$4 sm:$0xff]  }
 0x2bb   :  { %1319 = vst [vmem:[%s4198_s11] sm:$0xff] %v1301_v55  ;;  %v1305_v60 = vadd.f32 %v1304_v59, %v1099_v52  ;;  %v1306_v61 = vpop.f32.mrb[3].mxu1  ;;  %v1357_v59 = vld [vmem:[%s4194_s7] sm:$0x3] }
 0x2bc   :  { %1320 = vst [vmem:[%s4198_s11 + $0x8] sm:$0xff] %v1303_v58  ;;  %v1331_v63 = vmul.f32 %v1327_v57, %v1303_v58  ;;  %v1307_v0 = vadd.f32 %v1306_v61, %v1103_v53  ;;  %v3511_v57 = vld [vmem:[#allocation4 + $0x358] ss:$28 sps:$4 sm:$0xff]   ;;  %v3516_v58 = vld [vmem:[#allocation4 + $0xc] ss:$28 sps:$4 sm:$0xff]   ;;  %v1366_v61 = vrot.slane %v1357_v59, %v3981_v36 }
 0x2bd   :  { %1321 = vst [vmem:[%s4198_s11 + $0x10] sm:$0xff] %v1305_v60 }
 0x2be   :  { %v1335_v1 = vadd.f32 %v1331_v63, %v1301_v55  ;;  %1322 = vst [vmem:[%s4198_s11 + $0x18] sm:$0xff] %v1307_v0  ;;  %v1332_v2 = vmul.f32 %v1328_v62, %v1307_v0  ;;  %v3508_v55 = vld [vmem:[#allocation4 + $0x348] ss:$28 sps:$4 sm:$0xff]  }
 0x2c0   :  { %v1336_v3 = vadd.f32 %v1332_v2, %v1305_v60  ;;  %v1310_v4 = vpop.f32.mrb[4].mxu1  ;;  %v1362_v60 = vrot.slane %v1357_v59, %v3975_v34  ;;  %v3559_v59 = vld [vmem:[#allocation4 + $0x350] ss:$28 sps:$4 sm:$0xff]  }
 0x2c1   :  { %v1311_v5 = vadd.f32 %v1310_v4, %v1099_v52  ;;  %v1312_v6 = vpop.f32.mrb[5].mxu1 }
 0x2c2   :  { %v1339_v9 = vpack.c.bf16 %v1336_v3, %v1335_v1  ;;  %v1313_v10 = vadd.f32 %v1312_v6, %v1103_v53  ;;  %v1314_v11 = vpop.f32.mrb[6].mxu1 }
 0x2c3   :  { %1323 = vst [vmem:[%s4198_s11 + $0x20] sm:$0xff] %v1311_v5  ;;  %v1315_v13 = vadd.f32 %v1314_v11, %v1099_v52  ;;  %v1316_v14 = vpop.f32.mrb[7].mxu1  ;;  %v3507_v52 = vld [vmem:[#allocation4 + $0x324] ss:$28 sps:$4 sm:$0xff]  }
 0x2c4   :  { %1324 = vst [vmem:[%s4198_s11 + $0x28] sm:$0xff] %v1313_v10  ;;  %v1333_v17 = vmul.f32 %v1329_v7, %v1313_v10  ;;  %v1317_v18 = vadd.f32 %v1316_v14, %v1103_v53  ;;  %1482 = vmatmul.mubr.bf16.vlgmr.msra.gmra.mrb[8].mxu1 %v1339_v9  ;;  %v3505_v53 = vld [vmem:[#allocation4 + $0x320] ss:$28 sps:$4 sm:$0xff]   ;;  %2389 = vmatprep.subr.bf16.mxu0 %v3507_v52  ;;  %v3552_v52 = vld [vmem:[#allocation4 + $0x2ac] ss:$28 sps:$4 sm:$0xff]  }
 0x2c5   :  { %1325 = vst [vmem:[%s4198_s11 + $0x30] sm:$0xff] %v1315_v13  ;;  %1491 = vmatprep.mubr.bf16.mxu1 %v3744_v15  ;;  %2256 = vmatpush1.bf16.msra.mxu1 %v3418_v8  ;;  %v3444_v15 = vld [vmem:[#allocation4 + $0xe4] ss:$28 sps:$4 sm:$0xff]  }
 0x2c6   :  { %v1337_v20 = vadd.f32 %v1333_v17, %v1311_v5  ;;  %1326 = vst [vmem:[%s4198_s11 + $0x38] sm:$0xff] %v1317_v18  ;;  %v1334_v21 = vmul.f32 %v1330_v16, %v1317_v18  ;;  %2257 = vmatprep.subr.bf16.mxu1 %v3426_v12  ;;  %2390 = vmatpush1.bf16.msra.mxu0 %v3505_v53  ;;  %v3519_v17 = vld [vmem:[#allocation4 + $0x44] ss:$28 sps:$4 sm:$0xff]  }
 0x2c7   :  { %2391 = vmatprep.subr.bf16.mxu0 %v3513_v56  ;;  %v3550_v53 = vld [vmem:[#allocation4 + $0x2a8] ss:$28 sps:$4 sm:$0xff]   ;;  %v3558_v56 = vld [vmem:[#allocation4 + $0x31c] ss:$28 sps:$4 sm:$0xff]  }
 0x2c8   :  { %v1338_v23 = vadd.f32 %v1334_v21, %v1315_v13  ;;  %v3514_v13 = vld [vmem:[#allocation4 + $0x8] ss:$28 sps:$4 sm:$0xff]  }
 0x2c9   :  { %2258 = vmatpush1.bf16.msra.mxu1 %v3424_v19 }
 0x2ca   :  { %v1340_v25 = vpack.c.bf16 %v1338_v23, %v1337_v20  ;;  %2259 = vmatprep.subr.bf16.mxu1 %v3432_v22  ;;  %2392 = vmatpush1.bf16.msra.mxu0 %v3511_v57  ;;  %v3517_v23 = vld [vmem:[#allocation4 + $0x40] ss:$28 sps:$4 sm:$0xff]   ;;  %v3556_v57 = vld [vmem:[#allocation4 + $0x318] ss:$28 sps:$4 sm:$0xff]  }
 0x2cc   :  { %1492 = vmatmul.mubr.bf16.gmra.mrb[12].mxu1 %v1340_v25 }
 0x2cd   :  { %2260 = vmatpush1.bf16.msra.mxu1 %v3430_v24 }
 0x2ce   :  { %2261 = vmatprep.subr.bf16.mxu1 %v3438_v26  ;;  %v3522_v26 = vld [vmem:[#allocation4 + $0x7c] ss:$28 sps:$4 sm:$0xff]  }
 0x2d1   :  { %2262 = vmatpush1.bf16.msra.mxu1 %v3436_v27 }
 0x2d2   :  { %2263 = vmatprep.subr.bf16.mxu1 %v3444_v15 }
 0x2d5   :  { %2264 = vmatpush1.bf16.msra.mxu1 %v3442_v28 }
 0x2d6   :  { %2265 = vmatprep.subr.bf16.mxu1 %v3450_v29 }
 0x2d9   :  { %2266 = vmatpush1.bf16.msra.mxu1 %v3448_v30  ;;  %v3520_v30 = vld [vmem:[#allocation4 + $0x78] ss:$28 sps:$4 sm:$0xff]  }
 0x2da   :  { %2267 = vmatprep.subr.bf16.mxu1 %v3456_v31  ;;  %v3525_v31 = vld [vmem:[#allocation4 + $0xb4] ss:$28 sps:$4 sm:$0xff]  }
 0x2dd   :  { %2268 = vmatpush1.bf16.msra.mxu1 %v3454_v32  ;;  %v3523_v32 = vld [vmem:[#allocation4 + $0xb0] ss:$28 sps:$4 sm:$0xff]  }
 0x2de   :  { %2269 = vmatprep.subr.bf16.mxu1 %v3462_v35  ;;  %v3528_v35 = vld [vmem:[#allocation4 + $0xec] ss:$28 sps:$4 sm:$0xff]  }
 0x2e1   :  { %2270 = vmatpush1.bf16.msra.mxu1 %v3460_v37  ;;  %v3526_v37 = vld [vmem:[#allocation4 + $0xe8] ss:$28 sps:$4 sm:$0xff]  }
 0x2e2   :  { %2271 = vmatprep.subr.bf16.mxu1 %v3468_v38  ;;  %v3531_v38 = vld [vmem:[#allocation4 + $0x124] ss:$28 sps:$4 sm:$0xff]  }
 0x2e5   :  { %2272 = vmatpush1.bf16.msra.mxu1 %v3466_v39  ;;  %v3529_v39 = vld [vmem:[#allocation4 + $0x120] ss:$28 sps:$4 sm:$0xff]  }
 0x2e6   :  { %2273 = vmatprep.subr.bf16.mxu1 %v3474_v40  ;;  %v3534_v40 = vld [vmem:[#allocation4 + $0x15c] ss:$28 sps:$4 sm:$0xff]  }
 0x2e9   :  { %2274 = vmatpush1.bf16.msra.mxu1 %v3472_v41  ;;  %v3532_v41 = vld [vmem:[#allocation4 + $0x158] ss:$28 sps:$4 sm:$0xff]  }
 0x2ea   :  { %2275 = vmatprep.subr.bf16.mxu1 %v3480_v42  ;;  %v3537_v42 = vld [vmem:[#allocation4 + $0x194] ss:$28 sps:$4 sm:$0xff]  }
 0x2ed   :  { %2276 = vmatpush1.bf16.msra.mxu1 %v3478_v43  ;;  %v3535_v43 = vld [vmem:[#allocation4 + $0x190] ss:$28 sps:$4 sm:$0xff]  }
 0x2ee   :  { %2277 = vmatprep.subr.bf16.mxu1 %v3486_v44  ;;  %v3540_v44 = vld [vmem:[#allocation4 + $0x1cc] ss:$28 sps:$4 sm:$0xff]  }
 0x2f1   :  { %2278 = vmatpush1.bf16.msra.mxu1 %v3484_v45  ;;  %v3538_v45 = vld [vmem:[#allocation4 + $0x1c8] ss:$28 sps:$4 sm:$0xff]  }
 0x2f2   :  { %2279 = vmatprep.subr.bf16.mxu1 %v3492_v46  ;;  %v3543_v46 = vld [vmem:[#allocation4 + $0x204] ss:$28 sps:$4 sm:$0xff]  }
 0x2f5   :  { %2280 = vmatpush1.bf16.msra.mxu1 %v3490_v47  ;;  %v3541_v47 = vld [vmem:[#allocation4 + $0x200] ss:$28 sps:$4 sm:$0xff]  }
 0x2f6   :  { %2281 = vmatprep.subr.bf16.mxu1 %v3498_v48  ;;  %v3546_v48 = vld [vmem:[#allocation4 + $0x23c] ss:$28 sps:$4 sm:$0xff]  }
 0x2f9   :  { %2282 = vmatpush1.bf16.msra.mxu1 %v3496_v49  ;;  %v3544_v49 = vld [vmem:[#allocation4 + $0x238] ss:$28 sps:$4 sm:$0xff]  }
 0x2fa   :  { %2283 = vmatprep.subr.bf16.mxu1 %v3504_v50  ;;  %v3549_v50 = vld [vmem:[#allocation4 + $0x274] ss:$28 sps:$4 sm:$0xff]  }
 0x2fd   :  { %2284 = vmatpush1.bf16.msra.mxu1 %v3502_v51  ;;  %v3547_v51 = vld [vmem:[#allocation4 + $0x270] ss:$28 sps:$4 sm:$0xff]  }
 0x2fe   :  { %2285 = vmatprep.subr.bf16.mxu1 %v3510_v54  ;;  %v3555_v54 = vld [vmem:[#allocation4 + $0x2e4] ss:$28 sps:$4 sm:$0xff]  }
 0x301   :  { %2286 = vmatpush1.bf16.msra.mxu1 %v3508_v55  ;;  %v3553_v55 = vld [vmem:[#allocation4 + $0x2e0] ss:$28 sps:$4 sm:$0xff]  }
 0x302   :  { %2308 = vmatprep.subr.bf16.mxu1 %v3516_v58  ;;  %v3561_v58 = vld [vmem:[#allocation4 + $0x354] ss:$28 sps:$4 sm:$0xff]  }
 0x397   :  { %v1483_v62 = vpop.f32.mrb[8].mxu1 }
 0x398   :  { %v1484_v63 = vadd.f32 %v1483_v62, %v1362_v60  ;;  %v1485_v0 = vpop.f32.mrb[9].mxu1  ;;  %v3564_v62 = vld [vmem:[#allocation4 + $0x210] ss:$28 sps:$4 sm:$0xff]  }
 0x399   :  { %v1486_v1 = vadd.f32 %v1485_v0, %v1366_v61  ;;  %v1487_v2 = vpop.f32.mrb[10].mxu1  ;;  %v3566_v0 = vld [vmem:[#allocation4 + $0x248] ss:$28 sps:$4 sm:$0xff]  }
 0x39a   :  { %v1488_v3 = vadd.f32 %v1487_v2, %v1362_v60  ;;  %v1489_v4 = vpop.f32.mrb[11].mxu1  ;;  %v1502_v6 = vmax.f32 %v1484_v63, 0.0  ;;  %v3565_v63 = vld [vmem:[#allocation4 + $0x50] ss:$28 sps:$4 sm:$0xff]   ;;  %v3568_v2 = vld [vmem:[#allocation4 + $0x280] ss:$28 sps:$4 sm:$0xff]  }
 0x39b   :  { %v1490_v5 = vadd.f32 %v1489_v4, %v1366_v61  ;;  %v1503_v8 = vmax.f32 %v1486_v1, 0.0  ;;  %v3567_v1 = vld [vmem:[#allocation4 + $0x88] ss:$28 sps:$4 sm:$0xff]   ;;  %v3570_v4 = vld [vmem:[#allocation4 + $0x2b8] ss:$28 sps:$4 sm:$0xff]  }
 0x39c   :  { %v1504_v7 = vmax.f32 %v1488_v3, 0.0  ;;  %v3569_v3 = vld [vmem:[#allocation4 + $0xc0] ss:$28 sps:$4 sm:$0xff]  }
 0x39d   :  { %v1505_v9 = vmax.f32 %v1490_v5, 0.0  ;;  %v3571_v5 = vld [vmem:[#allocation4 + $0xf8] ss:$28 sps:$4 sm:$0xff]  }
 0x39e   :  { %v4078_v10 = vpack.c.bf16 %v1504_v7, %v1502_v6  ;;  %v3572_v6 = vld [vmem:[#allocation4 + $0x2f0] ss:$28 sps:$4 sm:$0xff]  }
 0x39f   :  { %v4080_v11 = vpack.c.bf16 %v1505_v9, %v1503_v8  ;;  %v1493_v12 = vpop.f32.mrb[12].mxu1  ;;  %v3573_v7 = vld [vmem:[#allocation4 + $0x130] ss:$28 sps:$4 sm:$0xff]   ;;  %v3574_v8 = vld [vmem:[#allocation4 + $0x328] ss:$28 sps:$4 sm:$0xff]  }
 0x3a0   :  { %v1494_v14 = vadd.f32 %v1493_v12, %v1362_v60  ;;  %v1495_v16 = vpop.f32.mrb[13].mxu1  ;;  %v3575_v9 = vld [vmem:[#allocation4 + $0x168] ss:$28 sps:$4 sm:$0xff]   ;;  %v3576_v12 = vld [vmem:[#allocation4 + $0x360] ss:$28 sps:$4 sm:$0xff]  }
 0x3a1   :  { %v1496_v18 = vadd.f32 %v1495_v16, %v1366_v61  ;;  %v1497_v19 = vpop.f32.mrb[14].mxu1  ;;  %2287 = vmatprep.mubr.bf16.mxu1 %v4080_v11  ;;  %2393 = vmatprep.mubr.bf16.mxu0 %v4080_v11  ;;  %v1666_v16 = vsub.s32 5, %v3972_v33 }
 0x3a2   :  { %v1498_v20 = vadd.f32 %v1497_v19, %v1362_v60  ;;  %v1499_v21 = vpop.f32.mrb[15].mxu1  ;;  %2288 = vmatmul.mubr.bf16.vlgmr.msra.gmra.mrb[16].mxu1 %v4078_v10  ;;  %2394 = vmatmul.mubr.bf16.vlgmr.msra.gmra.mrb[8].mxu0 %v4078_v10  ;;  %v1506_v24 = vmax.f32 %v1494_v14, 0.0  ;;  %v3562_v60 = vld [vmem:[#allocation4 + $0x1d8] ss:$28 sps:$4 sm:$0xff]   ;;  %v4106_v14 = vld [vmem:[%s4196_s9] sm:$0xff] }
 0x3a3   :  { %v1500_v22 = vadd.f32 %v1499_v21, %v1366_v61  ;;  %2309 = vmatpush1.bf16.msra.mxu1 %v3514_v13  ;;  %v1507_v27 = vmax.f32 %v1496_v18, 0.0  ;;  %v3563_v61 = vld [vmem:[#allocation4 + $0x18] ss:$28 sps:$4 sm:$0xff]   ;;  %v3577_v13 = vld [vmem:[#allocation4 + $0x1a0] ss:$28 sps:$4 sm:$0xff]   ;;  %v4119_v19 = vrot.slane %v4106_v14, %v1666_v16 }
 0x3a4   :  { %v1508_v25 = vmax.f32 %v1498_v20, 0.0  ;;  %2310 = vmatprep.subr.bf16.mxu1 %v3519_v17  ;;  %v1647_v17 = vrot.slane %v4106_v14, %v3975_v34 }
 0x3a5   :  { %v1509_v15 = vmax.f32 %v1500_v22, 0.0 }
 0x3a6   :  { %v4086_v28 = vpack.c.bf16 %v1508_v25, %v1506_v24 }
 0x3a7   :  { %v4088_v29 = vpack.c.bf16 %v1509_v15, %v1507_v27  ;;  %2311 = vmatpush1.bf16.msra.mxu1 %v3517_v23 }
 0x3a8   :  { %2312 = vmatprep.subr.bf16.mxu1 %v3522_v26 }
 0x3a9   :  { %2297 = vmatprep.mubr.bf16.mxu1 %v4088_v29  ;;  %2403 = vmatprep.mubr.bf16.mxu0 %v4088_v29 }
 0x3aa   :  { %2298 = vmatmul.mubr.bf16.gmra.mrb[20].mxu1 %v4086_v28  ;;  %2404 = vmatmul.mubr.bf16.gmra.mrb[12].mxu0 %v4086_v28 }
 0x3ab   :  { %2313 = vmatpush1.bf16.msra.mxu1 %v3520_v30  ;;  %2340 = vmatprep.mubr.bf16.mxu1 %v4080_v11 }
 0x3ac   :  { %2314 = vmatprep.subr.bf16.mxu1 %v3525_v31 }
 0x3af   :  { %2315 = vmatpush1.bf16.msra.mxu1 %v3523_v32 }
 0x3b0   :  { %2316 = vmatprep.subr.bf16.mxu1 %v3528_v35 }
 0x3b3   :  { %2317 = vmatpush1.bf16.msra.mxu1 %v3526_v37 }
 0x3b4   :  { %2318 = vmatprep.subr.bf16.mxu1 %v3531_v38 }
 0x3b7   :  { %2319 = vmatpush1.bf16.msra.mxu1 %v3529_v39 }
 0x3b8   :  { %2320 = vmatprep.subr.bf16.mxu1 %v3534_v40 }
 0x3bb   :  { %2321 = vmatpush1.bf16.msra.mxu1 %v3532_v41 }
 0x3bc   :  { %2322 = vmatprep.subr.bf16.mxu1 %v3537_v42 }
 0x3bf   :  { %2323 = vmatpush1.bf16.msra.mxu1 %v3535_v43 }
 0x3c0   :  { %2324 = vmatprep.subr.bf16.mxu1 %v3540_v44 }
 0x3c3   :  { %2325 = vmatpush1.bf16.msra.mxu1 %v3538_v45 }
 0x3c4   :  { %2326 = vmatprep.subr.bf16.mxu1 %v3543_v46 }
 0x3c7   :  { %2327 = vmatpush1.bf16.msra.mxu1 %v3541_v47 }
 0x3c8   :  { %2328 = vmatprep.subr.bf16.mxu1 %v3546_v48 }
 0x3cb   :  { %2329 = vmatpush1.bf16.msra.mxu1 %v3544_v49 }
 0x3cc   :  { %2330 = vmatprep.subr.bf16.mxu1 %v3549_v50 }
 0x3cf   :  { %2331 = vmatpush1.bf16.msra.mxu1 %v3547_v51 }
 0x3d0   :  { %2332 = vmatprep.subr.bf16.mxu1 %v3552_v52 }
 0x3d3   :  { %2333 = vmatpush1.bf16.msra.mxu1 %v3550_v53 }
 0x3d4   :  { %2334 = vmatprep.subr.bf16.mxu1 %v3555_v54 }
 0x3d7   :  { %2335 = vmatpush1.bf16.msra.mxu1 %v3553_v55 }
 0x3d8   :  { %2336 = vmatprep.subr.bf16.mxu1 %v3558_v56 }
 0x3db   :  { %2337 = vmatpush1.bf16.msra.mxu1 %v3556_v57 }
 0x3dc   :  { %2338 = vmatprep.subr.bf16.mxu1 %v3561_v58 }
 0x3df   :  { %2339 = vmatpush1.bf16.msra.mxu1 %v3559_v59 }
 0x3e0   :  { %3091 = vmatprep.subr.bf16.mxu1 %v3562_v60 }
 0x3e2   :  { %2341 = vmatmul.mubr.bf16.vlgmr.msra.gmra.mrb[24].mxu1 %v4078_v10 }
 0x3e3   :  { %2350 = vmatprep.mubr.bf16.mxu1 %v4088_v29  ;;  %3092 = vmatpush3.bf16.msra.mxu1 %v3563_v61 }
 0x3e4   :  { %3093 = vmatprep.subr.bf16.mxu1 %v3564_v62 }
 0x3e7   :  { %3094 = vmatpush3.bf16.msra.mxu1 %v3565_v63 }
 0x3e8   :  { %3095 = vmatprep.subr.bf16.mxu1 %v3566_v0 }
 0x3ea   :  { %2351 = vmatmul.mubr.bf16.gmra.mrb[28].mxu1 %v4086_v28 }
 0x3eb   :  { %3096 = vmatpush3.bf16.msra.mxu1 %v3567_v1  ;;  %2446 = vmatprep.mubr.bf16.mxu1 %v4080_v11  ;;  %v1662_v11 = vsub.s32 4, %v3972_v33 }
 0x3ec   :  { %3097 = vmatprep.subr.bf16.mxu1 %v3568_v2 }
 0x3ed   :  { %v4112_v18 = vrot.slane %v4106_v14, %v1662_v11 }
 0x3ef   :  { %3098 = vmatpush3.bf16.msra.mxu1 %v3569_v3 }
 0x3f0   :  { %3099 = vmatprep.subr.bf16.mxu1 %v3570_v4 }
 0x3f3   :  { %3100 = vmatpush3.bf16.msra.mxu1 %v3571_v5 }
 0x3f4   :  { %3101 = vmatprep.subr.bf16.mxu1 %v3572_v6 }
 0x3f7   :  { %3102 = vmatpush3.bf16.msra.mxu1 %v3573_v7 }
 0x3f8   :  { %3103 = vmatprep.subr.bf16.mxu1 %v3574_v8 }
 0x3fb   :  { %3104 = vmatpush3.bf16.msra.mxu1 %v3575_v9 }
 0x3fc   :  { %3105 = vmatprep.subr.bf16.mxu1 %v3576_v12 }
 0x3ff   :  { %3106 = vmatpush3.bf16.msra.mxu1 %v3577_v13 }
 0x402   :  { %2447 = vmatmul.mubr.bf16.vlgmr.msra.gmra.mrb[32].mxu1 %v4078_v10  ;;  %v4116_v10 = vrot.slane %v4106_v14, %v3981_v36 }
 0x403   :  { %2454 = vmatprep.mubr.bf16.mxu1 %v4088_v29 }
 0x40a   :  { %2455 = vmatmul.mubr.bf16.gmra.mrb[36].mxu1 %v4086_v28 }
 0x475   :  { %v2289_v20 = vpop.f32.mrb[16].mxu1  ;;  %v2395_v21 = vpop.f32.mrb[8].mxu0 }
 0x476   :  { %v2290_v22 = vadd.f32 %v2289_v20, %v1647_v17  ;;  %v2396_v23 = vadd.f32 %v2395_v21, %v4112_v18  ;;  %v2291_v24 = vpop.f32.mrb[17].mxu1  ;;  %v2397_v25 = vpop.f32.mrb[9].mxu0 }
 0x477   :  { %v2292_v26 = vadd.f32 %v2291_v24, %v4116_v10  ;;  %v2398_v34 = vadd.f32 %v2397_v25, %v4119_v19  ;;  %v2293_v27 = vpop.f32.mrb[18].mxu1  ;;  %v2399_v15 = vpop.f32.mrb[10].mxu0 }
 0x478   :  { %v3031_v28 = vmul.f32 -1.442695, %v2290_v22  ;;  %v3035_v29 = vmul.f32 -1.442695, %v2396_v23  ;;  %v2294_v36 = vadd.f32 %v2293_v27, %v1647_v17  ;;  %v2400_v30 = vadd.f32 %v2399_v15, %v4112_v18  ;;  %v2295_v31 = vpop.f32.mrb[19].mxu1  ;;  %v2401_v32 = vpop.f32.mrb[11].mxu0 }
 0x479   :  { %v3032_v35 = vmul.f32 -1.442695, %v2292_v26  ;;  %v3036_v37 = vmul.f32 -1.442695, %v2398_v34  ;;  %v2296_v38 = vadd.f32 %v2295_v31, %v4116_v10  ;;  %v2402_v39 = vadd.f32 %v2401_v32, %v4119_v19 }
 0x47a   :  { %3578 = vpow2.f32 %v3031_v28  ;;  %v3038_v40 = vmul.f32 -1.442695, %v2294_v36  ;;  %v3042_v41 = vmul.f32 -1.442695, %v2400_v30 }
 0x47b   :  { %3580 = vpow2.f32 %v3035_v29  ;;  %v3039_v42 = vmul.f32 -1.442695, %v2296_v38  ;;  %v3043_v43 = vmul.f32 -1.442695, %v2402_v39 }
 0x47c   :  { %3582 = vpow2.f32 %v3032_v35 }
 0x47d   :  { %3584 = vpow2.f32 %v3036_v37  ;;  %v2299_v44 = vpop.f32.mrb[20].mxu1  ;;  %v2405_v45 = vpop.f32.mrb[12].mxu0 }
 0x47e   :  { %3586 = vpow2.f32 %v3038_v40  ;;  %v2300_v46 = vadd.f32 %v2299_v44, %v1647_v17  ;;  %v2406_v47 = vadd.f32 %v2405_v45, %v4112_v18  ;;  %v2301_v48 = vpop.f32.mrb[21].mxu1  ;;  %v2407_v49 = vpop.f32.mrb[13].mxu0 }
 0x47f   :  { %3588 = vpow2.f32 %v3042_v41  ;;  %v2302_v50 = vadd.f32 %v2301_v48, %v4116_v10  ;;  %v2408_v51 = vadd.f32 %v2407_v49, %v4119_v19  ;;  %v2303_v52 = vpop.f32.mrb[22].mxu1  ;;  %v2409_v53 = vpop.f32.mrb[14].mxu0 }
 0x480   :  { %3590 = vpow2.f32 %v3039_v42  ;;  %v3045_v54 = vmul.f32 -1.442695, %v2300_v46  ;;  %v3049_v55 = vmul.f32 -1.442695, %v2406_v47  ;;  %v2304_v56 = vadd.f32 %v2303_v52, %v1647_v17  ;;  %v2305_v57 = vpop.f32.mrb[23].mxu1  ;;  %v2411_v58 = vpop.f32.mrb[15].mxu0 }
 0x481   :  { %3592 = vpow2.f32 %v3043_v43  ;;  %v3046_v59 = vmul.f32 -1.442695, %v2302_v50  ;;  %v3050_v60 = vmul.f32 -1.442695, %v2408_v51  ;;  %v2410_v20 = vadd.f32 %v2409_v53, %v4112_v18 }
 0x482   :  { %3594 = vpow2.f32 %v3045_v54  ;;  %v3052_v61 = vmul.f32 -1.442695, %v2304_v56  ;;  %v2306_v23 = vadd.f32 %v2305_v57, %v4116_v10  ;;  %v2412_v26 = vadd.f32 %v2411_v58, %v4119_v19 }
 0x483   :  { %3596 = vpow2.f32 %v3049_v55  ;;  %v3056_v29 = vmul.f32 -1.442695, %v2410_v20 }
 0x484   :  { %v3579_v62 = vpop.eup %3578  ;;  %3598 = vpow2.f32 %v3046_v59  ;;  %v3053_v18 = vmul.f32 -1.442695, %v2306_v23  ;;  %v3057_v31 = vmul.f32 -1.442695, %v2412_v26 }
 0x485   :  { %v3581_v63 = vpop.eup %3580  ;;  %v2547_v0 = vadd.f32 1.0, %v3579_v62  ;;  %3600 = vpow2.f32 %v3050_v60  ;;  %v1654_v62 = vsub.s32 2, %v3972_v33 }
 0x486   :  { %v3583_v1 = vpop.eup %3582  ;;  %v2551_v2 = vadd.f32 1.0, %v3581_v63  ;;  %3602 = vpow2.f32 %v3052_v61  ;;  %v1658_v63 = vsub.s32 3, %v3972_v33 }
 0x487   :  { %v3585_v3 = vpop.eup %3584  ;;  %3604 = vrcp.f32 %v2547_v0  ;;  %v2548_v4 = vadd.f32 1.0, %v3583_v1  ;;  %v1655_v0 = vrot.slane %v4106_v14, %v1654_v62 }
 0x488   :  { %v3587_v5 = vpop.eup %3586  ;;  %3606 = vrcp.f32 %v2551_v2  ;;  %v2552_v6 = vadd.f32 1.0, %v3585_v3  ;;  %v1659_v1 = vrot.slane %v4106_v14, %v1658_v63 }
 0x489   :  { %v3589_v7 = vpop.eup %3588  ;;  %3608 = vrcp.f32 %v2548_v4  ;;  %v2554_v8 = vadd.f32 1.0, %v3587_v5 }
 0x48a   :  { %v3591_v9 = vpop.eup %3590  ;;  %3610 = vrcp.f32 %v2552_v6  ;;  %v2558_v12 = vadd.f32 1.0, %v3589_v7 }
 0x48b   :  { %v3593_v13 = vpop.eup %3592  ;;  %3612 = vrcp.f32 %v2554_v8  ;;  %v2555_v11 = vadd.f32 1.0, %v3591_v9 }
 0x48c   :  { %v3595_v16 = vpop.eup %3594  ;;  %3614 = vrcp.f32 %v2558_v12  ;;  %v2559_v17 = vadd.f32 1.0, %v3593_v13 }
 0x48d   :  { %v3597_v21 = vpop.eup %3596  ;;  %3616 = vrcp.f32 %v2555_v11  ;;  %v2561_v22 = vadd.f32 1.0, %v3595_v16 }
 0x48e   :  { %v3599_v24 = vpop.eup %3598  ;;  %3618 = vrcp.f32 %v2559_v17  ;;  %v2565_v25 = vadd.f32 1.0, %v3597_v21 }
 0x48f   :  { %v3601_v34 = vpop.eup %3600  ;;  %3620 = vrcp.f32 %v2561_v22  ;;  %v2562_v27 = vadd.f32 1.0, %v3599_v24 }
 0x490   :  { %v3603_v15 = vpop.eup %3602  ;;  %3622 = vrcp.f32 %v2565_v25  ;;  %v2566_v28 = vadd.f32 1.0, %v3601_v34 }
 0x491   :  { %v3605_v36 = vpop.eup %3604  ;;  %3624 = vrcp.f32 %v2562_v27  ;;  %v2568_v48 = vadd.f32 1.0, %v3603_v15 }
 0x492   :  { %v3607_v30 = vpop.eup %3606  ;;  %3626 = vrcp.f32 %v2566_v28 }
 0x493   :  { %v3609_v32 = vpop.eup %3608  ;;  %3628 = vpow2.f32 %v3056_v29 }
 0x494   :  { %v3611_v10 = vpop.eup %3610  ;;  %v3075_v35 = vpack.c.bf16 %v3609_v32, %v3605_v36  ;;  %3630 = vpow2.f32 %v3053_v18 }
 0x495   :  { %v3613_v37 = vpop.eup %3612  ;;  %v3077_v38 = vpack.c.bf16 %v3611_v10, %v3607_v30  ;;  %3632 = vpow2.f32 %v3057_v31 }
 0x496   :  { %v3615_v19 = vpop.eup %3614  ;;  %2719 = vst [vmem:[%s4197_s10] sm:$0xff] %v3075_v35  ;;  %3634 = vrcp.f32 %v2568_v48 }
 0x497   :  { %v3617_v39 = vpop.eup %3616  ;;  %2721 = vst [vmem:[%s4197_s10 + $0x10] sm:$0xff] %v3077_v38 }
 0x498   :  { %v3619_v40 = vpop.eup %3618  ;;  %v3079_v41 = vpack.c.bf16 %v3617_v39, %v3613_v37 }
 0x499   :  { %v3621_v42 = vpop.eup %3620  ;;  %v3081_v43 = vpack.c.bf16 %v3619_v40, %v3615_v19 }
 0x49a   :  { %v3623_v44 = vpop.eup %3622  ;;  %2723 = vst [vmem:[%s4197_s10 + $0x1c] sm:$0xff] %v3079_v41 }
 0x49b   :  { %v3625_v45 = vpop.eup %3624  ;;  %2725 = vst [vmem:[%s4197_s10 + $0x2c] sm:$0xff] %v3081_v43 }
 0x49c   :  { %v3627_v46 = vpop.eup %3626  ;;  %v3083_v47 = vpack.c.bf16 %v3625_v45, %v3621_v42  ;;  %v1670_v45 = vsub.s32 6, %v3972_v33 }
 0x49d   :  { %v3085_v49 = vpack.c.bf16 %v3627_v46, %v3623_v44  ;;  %v3629_v50 = vpop.eup %3628 }
 0x49e   :  { %2727 = vst [vmem:[%s4197_s10 + $0x38] sm:$0xff] %v3083_v47  ;;  %v3631_v51 = vpop.eup %3630  ;;  %v2572_v52 = vadd.f32 1.0, %v3629_v50 }
 0x49f   :  { %2729 = vst [vmem:[%s4197_s10 + $0x48] sm:$0xff] %v3085_v49  ;;  %v3633_v53 = vpop.eup %3632  ;;  %v2569_v54 = vadd.f32 1.0, %v3631_v51 }
 0x4a0   :  { %3636 = vrcp.f32 %v2572_v52  ;;  %v2573_v55 = vadd.f32 1.0, %v3633_v53  ;;  %v3635_v56 = vpop.eup %3634  ;;  %v1671_v52 = vrot.slane %v4106_v14, %v1670_v45 }
 0x4a1   :  { %3638 = vrcp.f32 %v2569_v54 }
 0x4a2   :  { %3640 = vrcp.f32 %v2573_v55 }
 0x4aa   :  { %v3637_v57 = vpop.eup %3636 }
 0x4ab   :  { %v3639_v58 = vpop.eup %3638 }
 0x4ac   :  { %v3641_v59 = vpop.eup %3640  ;;  %v3087_v60 = vpack.c.bf16 %v3639_v58, %v3635_v56 }
 0x4ad   :  { %v3089_v61 = vpack.c.bf16 %v3641_v59, %v3637_v57 }
 0x4ae   :  { %2731 = vst [vmem:[%s4197_s10 + $0x54] sm:$0xff] %v3087_v60 }
 0x4af   :  { %2733 = vst [vmem:[%s4197_s10 + $0x64] sm:$0xff] %v3089_v61 }
 0x4b5   :  { %v2342_v2 = vpop.f32.mrb[24].mxu1 }
 0x4b6   :  { %v2343_v3 = vadd.f32 %v2342_v2, %v1655_v0  ;;  %v2344_v4 = vpop.f32.mrb[25].mxu1 }
 0x4b7   :  { %v2345_v5 = vadd.f32 %v2344_v4, %v1659_v1  ;;  %v2346_v6 = vpop.f32.mrb[26].mxu1 }
 0x4b8   :  { %v3033_v7 = vmul.f32 -1.442695, %v2343_v3  ;;  %v2347_v8 = vadd.f32 %v2346_v6, %v1655_v0  ;;  %v2348_v9 = vpop.f32.mrb[27].mxu1 }
 0x4b9   :  { %v3034_v12 = vmul.f32 -1.442695, %v2345_v5  ;;  %v2349_v13 = vadd.f32 %v2348_v9, %v1659_v1 }
 0x4ba   :  { %3642 = vpow2.f32 %v3033_v7  ;;  %v3040_v11 = vmul.f32 -1.442695, %v2347_v8 }
 0x4bb   :  { %3644 = vpow2.f32 %v3034_v12  ;;  %v3041_v16 = vmul.f32 -1.442695, %v2349_v13 }
 0x4bc   :  { %3646 = vpow2.f32 %v3040_v11 }
 0x4bd   :  { %3648 = vpow2.f32 %v3041_v16  ;;  %v2352_v17 = vpop.f32.mrb[28].mxu1 }
 0x4be   :  { %v2353_v20 = vadd.f32 %v2352_v17, %v1655_v0  ;;  %v2354_v21 = vpop.f32.mrb[29].mxu1 }
 0x4bf   :  { %v2355_v22 = vadd.f32 %v2354_v21, %v1659_v1  ;;  %v2356_v23 = vpop.f32.mrb[30].mxu1 }
 0x4c0   :  { %v3047_v24 = vmul.f32 -1.442695, %v2353_v20  ;;  %v2357_v25 = vadd.f32 %v2356_v23, %v1655_v0  ;;  %v2358_v26 = vpop.f32.mrb[31].mxu1 }
 0x4c1   :  { %v3048_v34 = vmul.f32 -1.442695, %v2355_v22  ;;  %v2359_v27 = vadd.f32 %v2358_v26, %v1659_v1 }
 0x4c2   :  { %3650 = vpow2.f32 %v3047_v24  ;;  %v3054_v15 = vmul.f32 -1.442695, %v2357_v25 }
 0x4c3   :  { %3652 = vpow2.f32 %v3048_v34  ;;  %v3055_v28 = vmul.f32 -1.442695, %v2359_v27 }
 0x4c4   :  { %v3643_v29 = vpop.eup %3642  ;;  %3654 = vpow2.f32 %v3054_v15 }
 0x4c5   :  { %v3645_v36 = vpop.eup %3644  ;;  %v2549_v18 = vadd.f32 1.0, %v3643_v29  ;;  %3656 = vpow2.f32 %v3055_v28 }
 0x4c6   :  { %v3647_v30 = vpop.eup %3646  ;;  %v2550_v31 = vadd.f32 1.0, %v3645_v36 }
 0x4c7   :  { %v3649_v32 = vpop.eup %3648  ;;  %3658 = vrcp.f32 %v2549_v18  ;;  %v2556_v10 = vadd.f32 1.0, %v3647_v30 }
 0x4c8   :  { %3660 = vrcp.f32 %v2550_v31  ;;  %v2557_v35 = vadd.f32 1.0, %v3649_v32 }
 0x4c9   :  { %3662 = vrcp.f32 %v2556_v10 }
 0x4ca   :  { %3664 = vrcp.f32 %v2557_v35 }
 0x4cc   :  { %v3651_v37 = vpop.eup %3650 }
 0x4cd   :  { %v3653_v38 = vpop.eup %3652  ;;  %v2563_v19 = vadd.f32 1.0, %v3651_v37 }
 0x4ce   :  { %v3655_v39 = vpop.eup %3654  ;;  %v2564_v40 = vadd.f32 1.0, %v3653_v38 }
 0x4cf   :  { %v3657_v41 = vpop.eup %3656  ;;  %3666 = vrcp.f32 %v2563_v19  ;;  %v2570_v42 = vadd.f32 1.0, %v3655_v39 }
 0x4d0   :  { %3668 = vrcp.f32 %v2564_v40  ;;  %v2571_v43 = vadd.f32 1.0, %v3657_v41 }
 0x4d1   :  { %v3659_v44 = vpop.eup %3658  ;;  %3670 = vrcp.f32 %v2570_v42 }
 0x4d2   :  { %v3661_v46 = vpop.eup %3660  ;;  %3672 = vrcp.f32 %v2571_v43 }
 0x4d3   :  { %v3663_v47 = vpop.eup %3662  ;;  %v3076_v48 = vpack.c.bf16 %v3661_v46, %v3659_v44 }
 0x4d4   :  { %v3665_v49 = vpop.eup %3664 }
 0x4d5   :  { %2720 = vst [vmem:[%s4197_s10 + $0x8] sm:$0xff] %v3076_v48  ;;  %v3080_v50 = vpack.c.bf16 %v3665_v49, %v3663_v47  ;;  %v3107_v51 = vpop.f32.mrb[32].mxu1 }
 0x4d6   :  { %v3108_v53 = vpop.f32.mrb[33].mxu1 }
 0x4d7   :  { %2724 = vst [vmem:[%s4197_s10 + $0x24] sm:$0xff] %v3080_v50  ;;  %v3109_v54 = vadd.f32 %v3108_v53, %v3107_v51  ;;  %v3110_v33 = vpop.f32.mrb[34].mxu1 }
 0x4d8   :  { %v3111_v55 = vpop.f32.mrb[35].mxu1 }
 0x4d9   :  { %v3667_v56 = vpop.eup %3666  ;;  %v2449_v57 = vadd.f32 %v3109_v54, %v1671_v52  ;;  %v3112_v58 = vadd.f32 %v3111_v55, %v3110_v33 }
 0x4da   :  { %v3669_v59 = vpop.eup %3668 }
 0x4db   :  { %v3671_v60 = vpop.eup %3670  ;;  %v3084_v61 = vpack.c.bf16 %v3669_v59, %v3667_v56  ;;  %v3037_v62 = vmul.f32 -1.442695, %v2449_v57  ;;  %v2452_v63 = vadd.f32 %v3112_v58, %v1671_v52 }
 0x4dc   :  { %v3673_v0 = vpop.eup %3672 }
 0x4dd   :  { %2728 = vst [vmem:[%s4197_s10 + $0x40] sm:$0xff] %v3084_v61  ;;  %v3088_v14 = vpack.c.bf16 %v3673_v0, %v3671_v60  ;;  %3674 = vpow2.f32 %v3037_v62  ;;  %v3044_v1 = vmul.f32 -1.442695, %v2452_v63  ;;  %v3113_v2 = vpop.f32.mrb[36].mxu1 }
 0x4de   :  { %v3114_v3 = vpop.f32.mrb[37].mxu1 }
 0x4df   :  { %2732 = vst [vmem:[%s4197_s10 + $0x5c] sm:$0xff] %v3088_v14  ;;  %3676 = vpow2.f32 %v3044_v1  ;;  %v3115_v4 = vadd.f32 %v3114_v3, %v3113_v2  ;;  %v3116_v5 = vpop.f32.mrb[38].mxu1 }
 0x4e0   :  { %v3117_v6 = vpop.f32.mrb[39].mxu1 }
 0x4e1   :  { %v2457_v7 = vadd.f32 %v3115_v4, %v1671_v52  ;;  %v3118_v8 = vadd.f32 %v3117_v6, %v3116_v5 }
 0x4e3   :  { %v3051_v9 = vmul.f32 -1.442695, %v2457_v7  ;;  %v2460_v12 = vadd.f32 %v3118_v8, %v1671_v52 }
 0x4e5   :  { %3678 = vpow2.f32 %v3051_v9  ;;  %v3058_v13 = vmul.f32 -1.442695, %v2460_v12 }
 0x4e7   :  { %v3675_v11 = vpop.eup %3674  ;;  %3680 = vpow2.f32 %v3058_v13 }
 0x4e8   :  { %v2553_v16 = vadd.f32 1.0, %v3675_v11 }
 0x4e9   :  { %v3677_v17 = vpop.eup %3676 }
 0x4ea   :  { %3682 = vrcp.f32 %v2553_v16  ;;  %v2560_v20 = vadd.f32 1.0, %v3677_v17 }
 0x4ec   :  { %3684 = vrcp.f32 %v2560_v20 }
 0x4ef   :  { %v3679_v21 = vpop.eup %3678 }
 0x4f0   :  { %v2567_v22 = vadd.f32 1.0, %v3679_v21 }
 0x4f1   :  { %v3681_v23 = vpop.eup %3680 }
 0x4f2   :  { %3686 = vrcp.f32 %v2567_v22  ;;  %v2574_v24 = vadd.f32 1.0, %v3681_v23 }
 0x4f4   :  { %v3683_v25 = vpop.eup %3682  ;;  %3688 = vrcp.f32 %v2574_v24 }
 0x4f5   :  { %v3078_v26 = vpack.c.bf16 %v3683_v25, %v3683_v25 }
 0x4f6   :  { %v3685_v34 = vpop.eup %3684 }
 0x4f7   :  { %2722 = vst [vmem:[%s4197_s10 + $0x18] sm:$0xf] %v3078_v26  ;;  %v3082_v27 = vpack.c.bf16 %v3685_v34, %v3685_v34 }
 0x4f9   :  { %2726 = vst [vmem:[%s4197_s10 + $0x34] sm:$0xf] %v3082_v27 }
 0x4fc   :  { %v3687_v15 = vpop.eup %3686 }
 0x4fd   :  { %v3086_v28 = vpack.c.bf16 %v3687_v15, %v3687_v15 }
 0x4fe   :  { %v3689_v29 = vpop.eup %3688 }
 0x4ff   :  { %2730 = vst [vmem:[%s4197_s10 + $0x50] sm:$0xf] %v3086_v28  ;;  %v3090_v36 = vpack.c.bf16 %v3689_v29, %v3689_v29 }
 0x501   :  { %2734 = vst [vmem:[%s4197_s10 + $0x6c] sm:$0xf] %v3090_v36 }
 0x502   :  { %2743 = vsyncpa [#allocation3], 1 }
 0x503   :  { %2744 = vsyncpa [#allocation5], 1 }

</bundles_post_ra>
